<compile_context>
chip_gen: v7x
topology: tpu7x:2x2x1
jax: 0.10.0
libtpu: 0.0.40
codegen_flags: <defaults>
</compile_context>

<pallas_src>
import functools
import math

import jax
import jax.numpy as jnp
from jax.experimental import pallas as pl
from jax.experimental.pallas import tpu as pltpu  # noqa: F401  (TPU backend)

# ----------------------------- model dims ----------------------------------
T_LEN   = 8          # max_len
BATCH   = 2
D_INP   = 4
D_PE    = 16         # transformer_default_args['d_pe']
D_Z     = D_INP + D_PE   # 20
D_FF    = 72         # trans_dim_feedforward
N_CLS   = 3
N_PROTO = 4
PE_MAX  = 10000.0
BT      = BATCH * T_LEN      # 16  (rows of the flattened activations)
BT2     = 2 * BT             # 32  (rows of the fused main+pret pass)

_ENC_ORDER = ('enc_main', 'enc_pret', 'enc_t')

# ------------------- lane layout of the single output slab ------------------
_OFF_PRED  = 0
_OFF_PREDM = _OFF_PRED + N_CLS
_OFF_ZMAIN = _OFF_PREDM + N_CLS
_OFF_ZMASK = _OFF_ZMAIN + D_Z
_OFF_LOGIT = _OFF_ZMASK + D_Z
_OFF_STE   = _OFF_LOGIT + T_LEN
_SLAB_W    = 128
_OUT_USED  = _OFF_STE + T_LEN
assert _OUT_USED <= _SLAB_W

# ------------------- lane layout of weight slab A (K = D_Z weights) ---------
_QKV_MP = 0            # 6*D_Z wide: [wq|wk|wv]_main | [wq|wk|wv]_pret  (fused QKV)
_QKV_T  = 128          # 3*D_Z wide
_WO_MP  = 192          # 2*D_Z wide: wo_main | wo_pret
_WO_T   = 232          # D_Z   wide
_W1_MP  = 256          # 256-wide block: w1_main at +0..F, w1_pret at +128..128+F
_W1_T   = 512          # D_FF  wide
_WA_W   = 640
assert _W1_T + D_FF <= _WA_W

# ------------------- layout of the misc slab (wmisc) ------------------------
_W2_ROWS = D_FF        # rows 0:72 hold the (F, D) weights
_W2_MP   = 0           # lanes 0:2D  = w2_main | w2_pret
_W2_T    = 2 * D_Z     # lanes 40:60 = w2_t
_VEC_R0  = _W2_ROWS    # bias/scale vector rows start here (32 rows)
_V_G1, _V_BE1, _V_B1, _V_B2, _V_G2, _V_BE2, _V_BC = range(7)
_V_STRIDE = 8          # rows per encoder in the vec region
_V_MG_W  = 24          # mask-generator weight row (within vec region)
_V_MG_B  = 25          # mask-generator bias row
_V_WCT   = 26          # classifier wc^T rows: enc_main 26..28, enc_t 29..31
_V_BLK   = 96          # lane offset of the (2BT, 2BT) block-diag additive mask
_WMISC_ROWS = _W2_ROWS + 32   # 104
_WMISC_W = 128
assert _V_BLK + BT2 <= _WMISC_W


# ----------------------------- kernel helpers --------------------------------
def _layernorm(x, eps=1e-5):
    mu = jnp.mean(x, axis=-1, keepdims=True)
    var = jnp.mean((x - mu) ** 2, axis=-1, keepdims=True)
    return (x - mu) * jax.lax.rsqrt(var + eps)


def _softmax(s):
    s = s - jnp.max(s, axis=-1, keepdims=True)
    p = jnp.exp(s)
    return p * pl.reciprocal(jnp.sum(p, axis=-1, keepdims=True), approx=True)


# ----------------------------- fused kernel ----------------------------------
def timex_fused_kernel(xb_ref, wa_ref, wm_ref, out_ref):
    D, F, C, T, B = D_Z, D_FF, N_CLS, T_LEN, BATCH
    scale = jnp.float32(1.0 / math.sqrt(D))

    x    = xb_ref[:, :D]          # (BT, D)  embedded src (data + PE channels)
    base = xb_ref[:, D:2 * D]     # (BT, D)  baseline (data channels; PE lanes 0)

    def vrow(r, w=D_Z):           # row of the bias/scale vector region
        return wm_ref[_VEC_R0 + r, :w]

    def evec(e, j, w=D_Z):        # per-encoder small vector
        return vrow(_V_STRIDE * e + j, w)

    # ============ enc_main + enc_pret fused along M (rows 0:BT main, BT:2BT pret)
    xn = _layernorm(x)                                                     # shared LN
    qkv = jnp.dot(xn, wa_ref[:, _QKV_MP:_QKV_MP + 6 * D],
                  preferred_element_type=jnp.float32)                      # (BT, 6D)
    q2 = jnp.concatenate([qkv[:, 0 * D:1 * D], qkv[:, 3 * D:4 * D]], axis=0)   # (2BT, D)
    k2 = jnp.concatenate([qkv[:, 1 * D:2 * D], qkv[:, 4 * D:5 * D]], axis=0)
    v2 = jnp.concatenate([qkv[:, 2 * D:3 * D], qkv[:, 5 * D:6 * D]], axis=0)

    # block-diagonal attention over 4 groups of T rows (encoder x batch)
    s = jax.lax.dot_general(q2, k2, (((1,), (1,)), ((), ())),
                            preferred_element_type=jnp.float32) * scale    # (2BT, 2BT)
    s = s + wm_ref[_VEC_R0:_VEC_R0 + BT2, _V_BLK:_V_BLK + BT2]             # +0 / -1e9 const
    p = _softmax(s)                                                        # cross-group exp -> 0
    attn = jnp.dot(p, v2, preferred_element_type=jnp.float32)              # (2BT, D)

    is_main = jax.lax.broadcasted_iota(jnp.int32, (BT2, 1), 0) < BT        # (2BT, 1)

    def sel2(res, w):             # pick main lanes [0:w] vs pret lanes [w:2w] per row
        return jnp.where(is_main, res[:, :w], res[:, w:2 * w])

    def vsel(j, w=D_Z):           # per-row main/pret small vector broadcast
        return jnp.where(is_main, evec(0, j, w)[None, :], evec(1, j, w)[None, :])

    attn = sel2(jnp.dot(attn, wa_ref[:, _WO_MP:_WO_MP + 2 * D],
                        preferred_element_type=jnp.float32), D)            # (2BT, D)
    xn2 = jnp.concatenate([xn, xn], axis=0)
    h1 = _layernorm(xn2 + attn) * vsel(_V_G1) + vsel(_V_BE1)

    f_res = jnp.dot(h1, wa_ref[:, _W1_MP:_W1_MP + 256],
                    preferred_element_type=jnp.float32)                    # (2BT, 256)
    f = jnp.where(is_main, f_res[:, :F], f_res[:, 128:128 + F]) + vsel(_V_B1, F)
    f = jnp.maximum(f, 0.0)
    f2 = sel2(jnp.dot(f, wm_ref[:_W2_ROWS, _W2_MP:_W2_MP + 2 * D],
                      preferred_element_type=jnp.float32), D) + vsel(_V_B2)
    h2 = _layernorm(h1 + f2) * vsel(_V_G2) + vsel(_V_BE2)                  # (2BT, D)

    h2_main, h2_pret = h2[:BT], h2[BT:]

    # enc_main aggregate ('mean'); enc_pret's dead classifier/mean are skipped.
    z_main = jnp.concatenate(
        [jnp.mean(h2_main[b * T:(b + 1) * T], axis=0, keepdims=True) for b in range(B)],
        axis=0)                                                            # (B, D)

    # ============ MaskGenerator: linear head on enc_pret per-timestep embeddings
    zseq_pret = h2_pret.reshape(B, T, D)
    wmv = vrow(_V_MG_W)                                                    # (D,)
    bm = vrow(_V_MG_B, 1)                                                  # (1,)
    logits = jnp.sum(zseq_pret * wmv[None, None, :], axis=-1) + bm         # (B, T)
    # sigmoid(logits) > 0.5  <=>  logits > 0  (sigmoid removed, exact-equivalent)
    ste = (logits > 0.0).astype(jnp.float32)                               # (B, T)
    # TODO(synk): Gumbel-softmax STE sampling replaced by its deterministic forward value.

    # ============ multivariate_mask: mask only the d_inp data channels (keep PE)
    x3 = x.reshape(B, T, D)
    base3 = base.reshape(B, T, D)
    m = ste[:, :, None]
    chan = jax.lax.broadcasted_iota(jnp.int32, (B, T, D), 2)
    x_masked = jnp.where(chan < D_INP, x3 * m + (1.0 - m) * base3, x3).reshape(BT, D)

    # ============ enc_t on the masked input, with the STE attention mask
    xn_t = _layernorm(x_masked)
    qkv_t = jnp.dot(xn_t, wa_ref[:, _QKV_T:_QKV_T + 3 * D],
                    preferred_element_type=jnp.float32)                    # (BT, 3D)
    q3 = qkv_t[:, 0 * D:1 * D].reshape(B, T, D)
    k3 = qkv_t[:, 1 * D:2 * D].reshape(B, T, D)
    v3 = qkv_t[:, 2 * D:3 * D].reshape(B, T, D)
    s3 = jnp.einsum('bqd,bkd->bqk', q3, k3, preferred_element_type=jnp.float32) * scale
    attn_mask = ste[:, :, None] * ste[:, None, :]                          # transform_to_attn_mask
    # TODO(synk): an all-zero ste row gives an all-zero mask -> uniform softmax (torch would NaN).
    s3 = jnp.where(attn_mask > 0.5, s3, jnp.float32(-1e9))
    p3 = _softmax(s3)
    attn_t = jnp.einsum('bqk,bkd->bqd', p3, v3,
                        preferred_element_type=jnp.float32).reshape(BT, D)
    attn_t = jnp.dot(attn_t, wa_ref[:, _WO_T:_WO_T + D],
                     preferred_element_type=jnp.float32)
    h1_t = _layernorm(xn_t + attn_t) * evec(2, _V_G1)[None, :] + evec(2, _V_BE1)[None, :]
    f_t = jnp.dot(h1_t, wa_ref[:, _W1_T:_W1_T + F],
                  preferred_element_type=jnp.float32) + evec(2, _V_B1, F)[None, :]
    f_t = jnp.maximum(f_t, 0.0)
    f_t = jnp.dot(f_t, wm_ref[:_W2_ROWS, _W2_T:_W2_T + D],
                  preferred_element_type=jnp.float32) + evec(2, _V_B2)[None, :]
    h2_t = _layernorm(h1_t + f_t) * evec(2, _V_G2)[None, :] + evec(2, _V_BE2)[None, :]

    z_mask = jnp.concatenate(
        [jnp.mean(h2_t[b * T:(b + 1) * T], axis=0, keepdims=True) for b in range(B)],
        axis=0)                                                            # (B, D)

    # ============ classifier heads on the VPU/XLU (2-row matmuls waste the MXU)
    def classify(z, wct_row0, bc):
        cols = [jnp.sum(z * vrow(wct_row0 + c)[None, :], axis=-1, keepdims=True)
                for c in range(C)]
        return jnp.concatenate(cols, axis=1) + bc[None, :]                 # (B, C)

    pred_main = classify(z_main, _V_WCT, evec(0, _V_BC, C))
    pred_mask = classify(z_mask, _V_WCT + C, evec(2, _V_BC, C))

    # ============ single lane-dense (B, 128) store of all outputs
    pad = jnp.zeros((B, _SLAB_W - _OUT_USED), jnp.float32)
    out_ref[...] = jnp.concatenate(
        [pred_main, pred_mask, z_main, z_mask, logits, ste, pad], axis=1)


# ----------------------------- glue ------------------------------------------
def positional_encoding(times, d_pe, max_val=PE_MAX):
    """times: (T, B) -> (T, B, d_pe) sin/cos PE (interleave via stack+reshape).
    (Could be hoisted/precomputed when `times` is a fixed arange.)"""
    div = jnp.exp(jnp.arange(0, d_pe, 2, dtype=jnp.float32) * (-math.log(max_val) / d_pe))
    ang = times[..., None].astype(jnp.float32) * div               # (T, B, d_pe//2)
    return jnp.stack([jnp.sin(ang), jnp.cos(ang)], axis=-1).reshape(times.shape + (d_pe,))


def timex_forward(packed, src, times, baseline_key):
    """Forward pass of TimeXModel (default ablation params). One Pallas launch."""
    T, B, d_inp = src.shape
    src_f = src.astype(jnp.float32)

    # Embedding computed ONCE: concat(src, PE); times identical for both embeds.
    pe = positional_encoding(times, D_PE)                                  # (T, B, d_pe)
    x_flat = jnp.transpose(jnp.concatenate([src_f, pe], axis=-1),
                           (1, 0, 2)).reshape(B * T, D_Z)                  # (BT, D_Z)

    # _get_baseline(B): sample N(mu, std) per batch element.
    mu, std = packed['masktoken_stats']
    baseline_tb = mu[:, None, :] + std[:, None, :] * jax.random.normal(
        baseline_key, (T, B, d_inp), jnp.float32)
    base_flat = jnp.transpose(baseline_tb, (1, 0, 2)).reshape(B * T, d_inp)
    base_flat = jnp.pad(base_flat, ((0, 0), (0, D_Z - d_inp)))             # (BT, D_Z)
    xb = jnp.concatenate([x_flat, base_flat], axis=1)                      # (BT, 2*D_Z) one DMA

    slab = pl.pallas_call(
        timex_fused_kernel,
        out_shape=jax.ShapeDtypeStruct((B, _SLAB_W), jnp.float32),
    )(xb, packed['wa'], packed['wmisc'])

    pred_regular = slab[:, _OFF_PRED:_OFF_PRED + N_CLS]
    pred_mask    = slab[:, _OFF_PREDM:_OFF_PREDM + N_CLS]
    z_main       = slab[:, _OFF_ZMAIN:_OFF_ZMAIN + D_Z]
    z_mask       = slab[:, _OFF_ZMASK:_OFF_ZMASK + D_Z]
    mask_logits  = slab[:, _OFF_LOGIT:_OFF_LOGIT + T]                      # (B, T)
    ste_mask     = slab[:, _OFF_STE:_OFF_STE + T]                          # (B, T)

    # exp_src reconstructed in the wrapper (identical arithmetic to in-kernel masking).
    m_tb = jnp.transpose(ste_mask)[..., None]                              # (T, B, 1)
    exp_src_tb = src_f * m_tb + (1.0 - m_tb) * baseline_tb                 # (T, B, d_inp)

    return {
        'pred': pred_regular,
        'pred_mask': pred_mask,
        'mask_logits': jnp.transpose(mask_logits),                         # (T, B)
        'ste_mask': ste_mask,
        'smooth_src': src,
        'all_z': (z_main, z_mask),
        'reference_z': (exp_src_tb, z_mask),
        'z_mask_list': z_mask,
    }


# ----------------------------- params ----------------------------------------
def init_encoder_params(key, D, F, C, scale=0.1):
    ks = jax.random.split(key, 7)
    return {
        'wq': scale * jax.random.normal(ks[0], (D, D), jnp.float32),
        'wk': scale * jax.random.normal(ks[1], (D, D), jnp.float32),
        'wv': scale * jax.random.normal(ks[2], (D, D), jnp.float32),
        'wo': scale * jax.random.normal(ks[3], (D, D), jnp.float32),
        'g1': jnp.ones((D,), jnp.float32), 'be1': jnp.zeros((D,), jnp.float32),
        'w1': scale * jax.random.normal(ks[4], (D, F), jnp.float32),
        'b1': jnp.zeros((F,), jnp.float32),
        'w2': scale * jax.random.normal(ks[5], (F, D), jnp.float32),
        'b2': jnp.zeros((D,), jnp.float32),
        'g2': jnp.ones((D,), jnp.float32), 'be2': jnp.zeros((D,), jnp.float32),
        'wc': scale * jax.random.normal(ks[6], (D, C), jnp.float32),
        'bc': jnp.zeros((C,), jnp.float32),
    }


def init_params(key):
    k_main, k_pret, k_t, k_m, k_p = jax.random.split(key, 5)
    return {
        'enc_main': init_encoder_params(k_main, D_Z, D_FF, N_CLS),
        'enc_pret': init_encoder_params(k_pret, D_Z, D_FF, N_CLS),
        'enc_t':    init_encoder_params(k_t, D_Z, D_FF, N_CLS),
        'maskgen': {
            'wm': jax.random.normal(k_m, (D_Z, 1), jnp.float32),
            'bm': jnp.zeros((1,), jnp.float32),
        },
        # masktoken_stats = (mu, std) per (time, channel)
        'masktoken_stats': (jnp.zeros((T_LEN, D_INP), jnp.float32),
                            0.1 * jnp.ones((T_LEN, D_INP), jnp.float32)),
        # prototypes exist as a parameter but are unused in the default forward
        # (ptype_assimilation=False in the default AblationParameters).
        'prototypes': jax.random.normal(k_p, (N_PROTO, D_Z), jnp.float32),
    }


def pack_params(params):
    """Pack the three encoders + mask generator into two padded VMEM slabs."""
    D, F, C = D_Z, D_FF, N_CLS
    enc = [params[e] for e in _ENC_ORDER]

    def qkv(p):
        return jnp.concatenate([p['wq'], p['wk'], p['wv']], axis=1)        # (D, 3D)

    # -------- slab A: every weight whose contraction dim is D_Z --------------
    wa = jnp.zeros((D, _WA_W), jnp.float32)
    wa = wa.at[:, _QKV_MP:_QKV_MP + 6 * D].set(
        jnp.concatenate([qkv(enc[0]), qkv(enc[1])], axis=1))               # fused main+pret QKV
    wa = wa.at[:, _QKV_T:_QKV_T + 3 * D].set(qkv(enc[2]))
    wa = wa.at[:, _WO_MP:_WO_MP + 2 * D].set(
        jnp.concatenate([enc[0]['wo'], enc[1]['wo']], axis=1))
    wa = wa.at[:, _WO_T:_WO_T + D].set(enc[2]['wo'])
    wa = wa.at[:, _W1_MP:_W1_MP + F].set(enc[0]['w1'])
    wa = wa.at[:, _W1_MP + 128:_W1_MP + 128 + F].set(enc[1]['w1'])         # lane-tile aligned
    wa = wa.at[:, _W1_T:_W1_T + F].set(enc[2]['w1'])

    # -------- misc slab: K=F weights, small vectors, maskgen, block mask -----
    wmisc = jnp.zeros((_WMISC_ROWS, _WMISC_W), jnp.float32)
    wmisc = wmisc.at[:F, _W2_MP:_W2_MP + 2 * D].set(
        jnp.concatenate([enc[0]['w2'], enc[1]['w2']], axis=1))
    wmisc = wmisc.at[:F, _W2_T:_W2_T + D].set(enc[2]['w2'])
    for e, p in enumerate(enc):
        r = _VEC_R0 + _V_STRIDE * e
        wmisc = wmisc.at[r + _V_G1, :D].set(p['g1'])
        wmisc = wmisc.at[r + _V_BE1, :D].set(p['be1'])
        wmisc = wmisc.at[r + _V_B1, :F].set(p['b1'])
        wmisc = wmisc.at[r + _V_B2, :D].set(p['b2'])
        wmisc = wmisc.at[r + _V_G2, :D].set(p['g2'])
        wmisc = wmisc.at[r + _V_BE2, :D].set(p['be2'])
        wmisc = wmisc.at[r + _V_BC, :C].set(p['bc'])
    wmisc = wmisc.at[_VEC_R0 + _V_MG_W, :D].set(params['maskgen']['wm'][:, 0])
    wmisc = wmisc.at[_VEC_R0 + _V_MG_B, 0].set(params['maskgen']['bm'][0])
    # wc^T rows for the VPU classifier heads (enc_main: 26..28, enc_t: 29..31)
    for c in range(C):
        wmisc = wmisc.at[_VEC_R0 + _V_WCT + c, :D].set(params['enc_main']['wc'][:, c])
        wmisc = wmisc.at[_VEC_R0 + _V_WCT + C + c, :D].set(params['enc_t']['wc'][:, c])
    # (2BT, 2BT) block-diagonal additive mask for the fused main+pret attention:
    # 0 within an (encoder, batch) group of T rows, -1e9 across groups.
    grp = jnp.arange(BT2) // T_LEN
    blk = jnp.where(grp[:, None] == grp[None, :], 0.0, -1e9).astype(jnp.float32)
    wmisc = wmisc.at[_VEC_R0:_VEC_R0 + BT2, _V_BLK:_V_BLK + BT2].set(blk)

    return {'wa': wa, 'wmisc': wmisc, 'masktoken_stats': params['masktoken_stats']}


# ----------------------------- main -------------------------------------------
if __name__ == "__main__":
    key = jax.random.PRNGKey(0)
    k_src, k_param, k_base = jax.random.split(key, 3)

    src = jax.random.normal(k_src, (T_LEN, BATCH, D_INP), jnp.float32)
    times = jnp.tile(jnp.arange(T_LEN, dtype=jnp.float32)[:, None], (1, BATCH))
    params = init_params(k_param)
    packed = pack_params(params)

    fwd = jax.jit(functools.partial(timex_forward, packed))
    out = fwd(src, times, k_base)
    out = jax.block_until_ready(out)

    # light sanity checks on shapes / values
    assert out['pred'].shape == (BATCH, N_CLS)
    assert out['pred_mask'].shape == (BATCH, N_CLS)
    assert out['mask_logits'].shape == (T_LEN, BATCH)
    assert out['ste_mask'].shape == (BATCH, T_LEN)
    assert out['all_z'][0].shape == (BATCH, D_Z)
    assert out['all_z'][1].shape == (BATCH, D_Z)
    assert out['reference_z'][0].shape == (T_LEN, BATCH, D_INP)
    assert bool(jnp.all(jnp.isfinite(out['pred'])))
    assert bool(jnp.all(jnp.isfinite(out['pred_mask'])))
    assert bool(jnp.all((out['ste_mask'] == 0.0) | (out['ste_mask'] == 1.0)))
    print("KERNEL_OK")
</pallas_src>

<mosaic_0001>
module attributes {stable_mosaic.version = 11 : i64} {
  func.func @timex_fused_kernel(%arg0: memref<16x40xf32, #tpu.memory_space<vmem>>, %arg1: memref<20x640xf32, #tpu.memory_space<vmem>>, %arg2: memref<104x128xf32, #tpu.memory_space<vmem>>, %arg3: memref<2x128xf32, #tpu.memory_space<vmem>>) attributes {dimension_semantics = [], scalar_prefetch = 0 : i64, scratch_operands = 0 : i64, tpu.core_type = #tpu.core_type<tc>} {
    %c0 = arith.constant 0 : index
    %c0_0 = arith.constant 0 : index
    %0 = vector.load %arg0[%c0, %c0_0] : memref<16x40xf32, #tpu.memory_space<vmem>>, vector<16x20xf32>
    %c0_1 = arith.constant 0 : index
    %c20 = arith.constant 20 : index
    %1 = vector.load %arg0[%c0_1, %c20] : memref<16x40xf32, #tpu.memory_space<vmem>>, vector<16x20xf32>
    %cst = arith.constant dense<0.000000e+00> : vector<16xf32>
    %2 = vector.multi_reduction <add>, %0, %cst [1] : vector<16x20xf32> to vector<16xf32>
    %3 = vector.shape_cast %2 : vector<16xf32> to vector<16x1xf32>
    %cst_2 = arith.constant 2.000000e+01 : f32
    %4 = vector.broadcast %cst_2 : f32 to vector<16x1xf32>
    %5 = arith.divf %3, %4 : vector<16x1xf32>
    %6 = vector.broadcast %5 : vector<16x1xf32> to vector<16x20xf32>
    %7 = arith.subf %0, %6 : vector<16x20xf32>
    %8 = arith.mulf %7, %7 : vector<16x20xf32>
    %cst_3 = arith.constant dense<0.000000e+00> : vector<16xf32>
    %9 = vector.multi_reduction <add>, %8, %cst_3 [1] : vector<16x20xf32> to vector<16xf32>
    %10 = vector.shape_cast %9 : vector<16xf32> to vector<16x1xf32>
    %cst_4 = arith.constant 2.000000e+01 : f32
    %11 = vector.broadcast %cst_4 : f32 to vector<16x1xf32>
    %12 = arith.divf %10, %11 : vector<16x1xf32>
    %13 = vector.broadcast %5 : vector<16x1xf32> to vector<16x20xf32>
    %14 = arith.subf %0, %13 : vector<16x20xf32>
    %cst_5 = arith.constant 9.99999974E-6 : f32
    %15 = vector.broadcast %cst_5 : f32 to vector<16x1xf32>
    %16 = arith.addf %12, %15 : vector<16x1xf32>
    %17 = math.rsqrt %16 : vector<16x1xf32>
    %18 = vector.broadcast %17 : vector<16x1xf32> to vector<16x20xf32>
    %19 = arith.mulf %14, %18 : vector<16x20xf32>
    %c0_6 = arith.constant 0 : index
    %c0_7 = arith.constant 0 : index
    %20 = vector.load %arg1[%c0_6, %c0_7] : memref<20x640xf32, #tpu.memory_space<vmem>>, vector<20x120xf32>
    %cst_8 = arith.constant dense<0.000000e+00> : vector<16x120xf32>
    %21 = tpu.matmul %19, %20, %cst_8 {dimension_numbers = #tpu.dot_dimension_numbers<[1], [0], [0], [1], [0, 0, 1, 1], [], []>} : vector<16x20xf32>, vector<20x120xf32>, vector<16x120xf32> -> vector<16x120xf32>
    %22 = vector.extract_strided_slice %21 {offsets = [0, 0], sizes = [16, 20], strides = [1, 1]} : vector<16x120xf32> to vector<16x20xf32>
    %23 = vector.extract_strided_slice %21 {offsets = [0, 60], sizes = [16, 20], strides = [1, 1]} : vector<16x120xf32> to vector<16x20xf32>
    %24 = tpu.concatenate %22, %23 in 0 : vector<16x20xf32>, vector<16x20xf32> -> vector<32x20xf32>
    %25 = vector.extract_strided_slice %21 {offsets = [0, 20], sizes = [16, 20], strides = [1, 1]} : vector<16x120xf32> to vector<16x20xf32>
    %26 = vector.extract_strided_slice %21 {offsets = [0, 80], sizes = [16, 20], strides = [1, 1]} : vector<16x120xf32> to vector<16x20xf32>
    %27 = tpu.concatenate %25, %26 in 0 : vector<16x20xf32>, vector<16x20xf32> -> vector<32x20xf32>
    %28 = vector.extract_strided_slice %21 {offsets = [0, 40], sizes = [16, 20], strides = [1, 1]} : vector<16x120xf32> to vector<16x20xf32>
    %29 = vector.extract_strided_slice %21 {offsets = [0, 100], sizes = [16, 20], strides = [1, 1]} : vector<16x120xf32> to vector<16x20xf32>
    %30 = tpu.concatenate %28, %29 in 0 : vector<16x20xf32>, vector<16x20xf32> -> vector<32x20xf32>
    %cst_9 = arith.constant dense<0.000000e+00> : vector<32x32xf32>
    %31 = tpu.matmul %24, %27, %cst_9 {dimension_numbers = #tpu.dot_dimension_numbers<[1], [1], [0], [0], [0, 0, 1, 0], [], []>} : vector<32x20xf32>, vector<32x20xf32>, vector<32x32xf32> -> vector<32x32xf32>
    %cst_10 = arith.constant 0.223606795 : f32
    %32 = vector.broadcast %cst_10 : f32 to vector<32x32xf32>
    %33 = arith.mulf %31, %32 : vector<32x32xf32>
    %c72 = arith.constant 72 : index
    %c96 = arith.constant 96 : index
    %34 = vector.load %arg2[%c72, %c96] : memref<104x128xf32, #tpu.memory_space<vmem>>, vector<32x32xf32>
    %35 = arith.addf %33, %34 : vector<32x32xf32>
    %cst_11 = arith.constant dense<0xFF800000> : vector<32xf32>
    %36 = vector.multi_reduction <maximumf>, %35, %cst_11 [1] : vector<32x32xf32> to vector<32xf32>
    %37 = vector.shape_cast %36 : vector<32xf32> to vector<32x1xf32>
    %38 = vector.broadcast %37 : vector<32x1xf32> to vector<32x32xf32>
    %39 = arith.subf %35, %38 : vector<32x32xf32>
    %40 = math.exp %39 : vector<32x32xf32>
    %cst_12 = arith.constant dense<0.000000e+00> : vector<32xf32>
    %41 = vector.multi_reduction <add>, %40, %cst_12 [1] : vector<32x32xf32> to vector<32xf32>
    %42 = vector.shape_cast %41 : vector<32xf32> to vector<32x1xf32>
    %43 = tpu.reciprocal %42 {approx = true} : vector<32x1xf32> -> vector<32x1xf32>
    %44 = vector.broadcast %43 : vector<32x1xf32> to vector<32x32xf32>
    %45 = arith.mulf %40, %44 : vector<32x32xf32>
    %cst_13 = arith.constant dense<0.000000e+00> : vector<32x20xf32>
    %46 = tpu.matmul %45, %30, %cst_13 {dimension_numbers = #tpu.dot_dimension_numbers<[1], [0], [0], [1], [0, 0, 1, 1], [], []>} : vector<32x32xf32>, vector<32x20xf32>, vector<32x20xf32> -> vector<32x20xf32>
    %47 = tpu.iota {dimensions = array<i32: 0>} : vector<32x1xi32>
    %c16_i32 = arith.constant 16 : i32
    %48 = vector.broadcast %c16_i32 : i32 to vector<32x1xi32>
    %49 = arith.cmpi slt, %47, %48 : vector<32x1xi32>
    %c0_14 = arith.constant 0 : index
    %c192 = arith.constant 192 : index
    %50 = vector.load %arg1[%c0_14, %c192] : memref<20x640xf32, #tpu.memory_space<vmem>>, vector<20x40xf32>
    %cst_15 = arith.constant dense<0.000000e+00> : vector<32x40xf32>
    %51 = tpu.matmul %46, %50, %cst_15 {dimension_numbers = #tpu.dot_dimension_numbers<[1], [0], [0], [1], [0, 0, 1, 1], [], []>} : vector<32x20xf32>, vector<20x40xf32>, vector<32x40xf32> -> vector<32x40xf32>
    %52 = vector.extract_strided_slice %51 {offsets = [0, 0], sizes = [32, 20], strides = [1, 1]} : vector<32x40xf32> to vector<32x20xf32>
    %53 = vector.extract_strided_slice %51 {offsets = [0, 20], sizes = [32, 20], strides = [1, 1]} : vector<32x40xf32> to vector<32x20xf32>
    %54 = vector.shape_cast %49 : vector<32x1xi1> to vector<32x1xi1>
    %55 = vector.broadcast %54 : vector<32x1xi1> to vector<32x20xi1>
    %56 = arith.select %55, %52, %53 : vector<32x20xi1>, vector<32x20xf32>
    %57 = tpu.concatenate %19, %19 in 0 : vector<16x20xf32>, vector<16x20xf32> -> vector<32x20xf32>
    %58 = arith.addf %57, %56 : vector<32x20xf32>
    %cst_16 = arith.constant dense<0.000000e+00> : vector<32xf32>
    %59 = vector.multi_reduction <add>, %58, %cst_16 [1] : vector<32x20xf32> to vector<32xf32>
    %60 = vector.shape_cast %59 : vector<32xf32> to vector<32x1xf32>
    %cst_17 = arith.constant 2.000000e+01 : f32
    %61 = vector.broadcast %cst_17 : f32 to vector<32x1xf32>
    %62 = arith.divf %60, %61 : vector<32x1xf32>
    %63 = vector.broadcast %62 : vector<32x1xf32> to vector<32x20xf32>
    %64 = arith.subf %58, %63 : vector<32x20xf32>
    %65 = arith.mulf %64, %64 : vector<32x20xf32>
    %cst_18 = arith.constant dense<0.000000e+00> : vector<32xf32>
    %66 = vector.multi_reduction <add>, %65, %cst_18 [1] : vector<32x20xf32> to vector<32xf32>
    %67 = vector.shape_cast %66 : vector<32xf32> to vector<32x1xf32>
    %cst_19 = arith.constant 2.000000e+01 : f32
    %68 = vector.broadcast %cst_19 : f32 to vector<32x1xf32>
    %69 = arith.divf %67, %68 : vector<32x1xf32>
    %70 = vector.broadcast %62 : vector<32x1xf32> to vector<32x20xf32>
    %71 = arith.subf %58, %70 : vector<32x20xf32>
    %cst_20 = arith.constant 9.99999974E-6 : f32
    %72 = vector.broadcast %cst_20 : f32 to vector<32x1xf32>
    %73 = arith.addf %69, %72 : vector<32x1xf32>
    %74 = math.rsqrt %73 : vector<32x1xf32>
    %75 = vector.broadcast %74 : vector<32x1xf32> to vector<32x20xf32>
    %76 = arith.mulf %71, %75 : vector<32x20xf32>
    %c72_21 = arith.constant 72 : index
    %c0_22 = arith.constant 0 : index
    %77 = vector.load %arg2[%c72_21, %c0_22] : memref<104x128xf32, #tpu.memory_space<vmem>>, vector<1x20xf32>
    %78 = vector.shape_cast %77 : vector<1x20xf32> to vector<20xf32>
    %79 = vector.shape_cast %78 : vector<20xf32> to vector<1x20xf32>
    %c80 = arith.constant 80 : index
    %c0_23 = arith.constant 0 : index
    %80 = vector.load %arg2[%c80, %c0_23] : memref<104x128xf32, #tpu.memory_space<vmem>>, vector<1x20xf32>
    %81 = vector.shape_cast %80 : vector<1x20xf32> to vector<20xf32>
    %82 = vector.shape_cast %81 : vector<20xf32> to vector<1x20xf32>
    %83 = vector.shape_cast %49 : vector<32x1xi1> to vector<32x1xi1>
    %84 = vector.broadcast %83 : vector<32x1xi1> to vector<32x20xi1>
    %85 = vector.shape_cast %79 : vector<1x20xf32> to vector<1x20xf32>
    %86 = vector.broadcast %85 : vector<1x20xf32> to vector<32x20xf32>
    %87 = vector.shape_cast %82 : vector<1x20xf32> to vector<1x20xf32>
    %88 = vector.broadcast %87 : vector<1x20xf32> to vector<32x20xf32>
    %89 = arith.select %84, %86, %88 : vector<32x20xi1>, vector<32x20xf32>
    %90 = arith.mulf %76, %89 : vector<32x20xf32>
    %c73 = arith.constant 73 : index
    %c0_24 = arith.constant 0 : index
    %91 = vector.load %arg2[%c73, %c0_24] : memref<104x128xf32, #tpu.memory_space<vmem>>, vector<1x20xf32>
    %92 = vector.shape_cast %91 : vector<1x20xf32> to vector<20xf32>
    %93 = vector.shape_cast %92 : vector<20xf32> to vector<1x20xf32>
    %c81 = arith.constant 81 : index
    %c0_25 = arith.constant 0 : index
    %94 = vector.load %arg2[%c81, %c0_25] : memref<104x128xf32, #tpu.memory_space<vmem>>, vector<1x20xf32>
    %95 = vector.shape_cast %94 : vector<1x20xf32> to vector<20xf32>
    %96 = vector.shape_cast %95 : vector<20xf32> to vector<1x20xf32>
    %97 = vector.shape_cast %49 : vector<32x1xi1> to vector<32x1xi1>
    %98 = vector.broadcast %97 : vector<32x1xi1> to vector<32x20xi1>
    %99 = vector.shape_cast %93 : vector<1x20xf32> to vector<1x20xf32>
    %100 = vector.broadcast %99 : vector<1x20xf32> to vector<32x20xf32>
    %101 = vector.shape_cast %96 : vector<1x20xf32> to vector<1x20xf32>
    %102 = vector.broadcast %101 : vector<1x20xf32> to vector<32x20xf32>
    %103 = arith.select %98, %100, %102 : vector<32x20xi1>, vector<32x20xf32>
    %104 = arith.addf %90, %103 : vector<32x20xf32>
    %c0_26 = arith.constant 0 : index
    %c256 = arith.constant 256 : index
    %105 = vector.load %arg1[%c0_26, %c256] : memref<20x640xf32, #tpu.memory_space<vmem>>, vector<20x256xf32>
    %cst_27 = arith.constant dense<0.000000e+00> : vector<32x256xf32>
    %106 = tpu.matmul %104, %105, %cst_27 {dimension_numbers = #tpu.dot_dimension_numbers<[1], [0], [0], [1], [0, 0, 1, 1], [], []>} : vector<32x20xf32>, vector<20x256xf32>, vector<32x256xf32> -> vector<32x256xf32>
    %107 = vector.extract_strided_slice %106 {offsets = [0, 0], sizes = [32, 72], strides = [1, 1]} : vector<32x256xf32> to vector<32x72xf32>
    %108 = vector.extract_strided_slice %106 {offsets = [0, 128], sizes = [32, 72], strides = [1, 1]} : vector<32x256xf32> to vector<32x72xf32>
    %109 = vector.shape_cast %49 : vector<32x1xi1> to vector<32x1xi1>
    %110 = vector.broadcast %109 : vector<32x1xi1> to vector<32x72xi1>
    %111 = arith.select %110, %107, %108 : vector<32x72xi1>, vector<32x72xf32>
    %c74 = arith.constant 74 : index
    %c0_28 = arith.constant 0 : index
    %112 = vector.load %arg2[%c74, %c0_28] : memref<104x128xf32, #tpu.memory_space<vmem>>, vector<1x72xf32>
    %113 = vector.shape_cast %112 : vector<1x72xf32> to vector<72xf32>
    %114 = vector.shape_cast %113 : vector<72xf32> to vector<1x72xf32>
    %c82 = arith.constant 82 : index
    %c0_29 = arith.constant 0 : index
    %115 = vector.load %arg2[%c82, %c0_29] : memref<104x128xf32, #tpu.memory_space<vmem>>, vector<1x72xf32>
    %116 = vector.shape_cast %115 : vector<1x72xf32> to vector<72xf32>
    %117 = vector.shape_cast %116 : vector<72xf32> to vector<1x72xf32>
    %118 = vector.shape_cast %49 : vector<32x1xi1> to vector<32x1xi1>
    %119 = vector.broadcast %118 : vector<32x1xi1> to vector<32x72xi1>
    %120 = vector.shape_cast %114 : vector<1x72xf32> to vector<1x72xf32>
    %121 = vector.broadcast %120 : vector<1x72xf32> to vector<32x72xf32>
    %122 = vector.shape_cast %117 : vector<1x72xf32> to vector<1x72xf32>
    %123 = vector.broadcast %122 : vector<1x72xf32> to vector<32x72xf32>
    %124 = arith.select %119, %121, %123 : vector<32x72xi1>, vector<32x72xf32>
    %125 = arith.addf %111, %124 : vector<32x72xf32>
    %cst_30 = arith.constant 0.000000e+00 : f32
    %126 = vector.broadcast %cst_30 : f32 to vector<32x72xf32>
    %127 = arith.maximumf %125, %126 : vector<32x72xf32>
    %c0_31 = arith.constant 0 : index
    %c0_32 = arith.constant 0 : index
    %128 = vector.load %arg2[%c0_31, %c0_32] : memref<104x128xf32, #tpu.memory_space<vmem>>, vector<72x40xf32>
    %cst_33 = arith.constant dense<0.000000e+00> : vector<32x40xf32>
    %129 = tpu.matmul %127, %128, %cst_33 {dimension_numbers = #tpu.dot_dimension_numbers<[1], [0], [0], [1], [0, 0, 1, 1], [], []>} : vector<32x72xf32>, vector<72x40xf32>, vector<32x40xf32> -> vector<32x40xf32>
    %130 = vector.extract_strided_slice %129 {offsets = [0, 0], sizes = [32, 20], strides = [1, 1]} : vector<32x40xf32> to vector<32x20xf32>
    %131 = vector.extract_strided_slice %129 {offsets = [0, 20], sizes = [32, 20], strides = [1, 1]} : vector<32x40xf32> to vector<32x20xf32>
    %132 = vector.shape_cast %49 : vector<32x1xi1> to vector<32x1xi1>
    %133 = vector.broadcast %132 : vector<32x1xi1> to vector<32x20xi1>
    %134 = arith.select %133, %130, %131 : vector<32x20xi1>, vector<32x20xf32>
    %c75 = arith.constant 75 : index
    %c0_34 = arith.constant 0 : index
    %135 = vector.load %arg2[%c75, %c0_34] : memref<104x128xf32, #tpu.memory_space<vmem>>, vector<1x20xf32>
    %136 = vector.shape_cast %135 : vector<1x20xf32> to vector<20xf32>
    %137 = vector.shape_cast %136 : vector<20xf32> to vector<1x20xf32>
    %c83 = arith.constant 83 : index
    %c0_35 = arith.constant 0 : index
    %138 = vector.load %arg2[%c83, %c0_35] : memref<104x128xf32, #tpu.memory_space<vmem>>, vector<1x20xf32>
    %139 = vector.shape_cast %138 : vector<1x20xf32> to vector<20xf32>
    %140 = vector.shape_cast %139 : vector<20xf32> to vector<1x20xf32>
    %141 = vector.shape_cast %49 : vector<32x1xi1> to vector<32x1xi1>
    %142 = vector.broadcast %141 : vector<32x1xi1> to vector<32x20xi1>
    %143 = vector.shape_cast %137 : vector<1x20xf32> to vector<1x20xf32>
    %144 = vector.broadcast %143 : vector<1x20xf32> to vector<32x20xf32>
    %145 = vector.shape_cast %140 : vector<1x20xf32> to vector<1x20xf32>
    %146 = vector.broadcast %145 : vector<1x20xf32> to vector<32x20xf32>
    %147 = arith.select %142, %144, %146 : vector<32x20xi1>, vector<32x20xf32>
    %148 = arith.addf %134, %147 : vector<32x20xf32>
    %149 = arith.addf %104, %148 : vector<32x20xf32>
    %cst_36 = arith.constant dense<0.000000e+00> : vector<32xf32>
    %150 = vector.multi_reduction <add>, %149, %cst_36 [1] : vector<32x20xf32> to vector<32xf32>
    %151 = vector.shape_cast %150 : vector<32xf32> to vector<32x1xf32>
    %cst_37 = arith.constant 2.000000e+01 : f32
    %152 = vector.broadcast %cst_37 : f32 to vector<32x1xf32>
    %153 = arith.divf %151, %152 : vector<32x1xf32>
    %154 = vector.broadcast %153 : vector<32x1xf32> to vector<32x20xf32>
    %155 = arith.subf %149, %154 : vector<32x20xf32>
    %156 = arith.mulf %155, %155 : vector<32x20xf32>
    %cst_38 = arith.constant dense<0.000000e+00> : vector<32xf32>
    %157 = vector.multi_reduction <add>, %156, %cst_38 [1] : vector<32x20xf32> to vector<32xf32>
    %158 = vector.shape_cast %157 : vector<32xf32> to vector<32x1xf32>
    %cst_39 = arith.constant 2.000000e+01 : f32
    %159 = vector.broadcast %cst_39 : f32 to vector<32x1xf32>
    %160 = arith.divf %158, %159 : vector<32x1xf32>
    %161 = vector.broadcast %153 : vector<32x1xf32> to vector<32x20xf32>
    %162 = arith.subf %149, %161 : vector<32x20xf32>
    %cst_40 = arith.constant 9.99999974E-6 : f32
    %163 = vector.broadcast %cst_40 : f32 to vector<32x1xf32>
    %164 = arith.addf %160, %163 : vector<32x1xf32>
    %165 = math.rsqrt %164 : vector<32x1xf32>
    %166 = vector.broadcast %165 : vector<32x1xf32> to vector<32x20xf32>
    %167 = arith.mulf %162, %166 : vector<32x20xf32>
    %c76 = arith.constant 76 : index
    %c0_41 = arith.constant 0 : index
    %168 = vector.load %arg2[%c76, %c0_41] : memref<104x128xf32, #tpu.memory_space<vmem>>, vector<1x20xf32>
    %169 = vector.shape_cast %168 : vector<1x20xf32> to vector<20xf32>
    %170 = vector.shape_cast %169 : vector<20xf32> to vector<1x20xf32>
    %c84 = arith.constant 84 : index
    %c0_42 = arith.constant 0 : index
    %171 = vector.load %arg2[%c84, %c0_42] : memref<104x128xf32, #tpu.memory_space<vmem>>, vector<1x20xf32>
    %172 = vector.shape_cast %171 : vector<1x20xf32> to vector<20xf32>
    %173 = vector.shape_cast %172 : vector<20xf32> to vector<1x20xf32>
    %174 = vector.shape_cast %49 : vector<32x1xi1> to vector<32x1xi1>
    %175 = vector.broadcast %174 : vector<32x1xi1> to vector<32x20xi1>
    %176 = vector.shape_cast %170 : vector<1x20xf32> to vector<1x20xf32>
    %177 = vector.broadcast %176 : vector<1x20xf32> to vector<32x20xf32>
    %178 = vector.shape_cast %173 : vector<1x20xf32> to vector<1x20xf32>
    %179 = vector.broadcast %178 : vector<1x20xf32> to vector<32x20xf32>
    %180 = arith.select %175, %177, %179 : vector<32x20xi1>, vector<32x20xf32>
    %181 = arith.mulf %167, %180 : vector<32x20xf32>
    %c77 = arith.constant 77 : index
    %c0_43 = arith.constant 0 : index
    %182 = vector.load %arg2[%c77, %c0_43] : memref<104x128xf32, #tpu.memory_space<vmem>>, vector<1x20xf32>
    %183 = vector.shape_cast %182 : vector<1x20xf32> to vector<20xf32>
    %184 = vector.shape_cast %183 : vector<20xf32> to vector<1x20xf32>
    %c85 = arith.constant 85 : index
    %c0_44 = arith.constant 0 : index
    %185 = vector.load %arg2[%c85, %c0_44] : memref<104x128xf32, #tpu.memory_space<vmem>>, vector<1x20xf32>
    %186 = vector.shape_cast %185 : vector<1x20xf32> to vector<20xf32>
    %187 = vector.shape_cast %186 : vector<20xf32> to vector<1x20xf32>
    %188 = vector.shape_cast %49 : vector<32x1xi1> to vector<32x1xi1>
    %189 = vector.broadcast %188 : vector<32x1xi1> to vector<32x20xi1>
    %190 = vector.shape_cast %184 : vector<1x20xf32> to vector<1x20xf32>
    %191 = vector.broadcast %190 : vector<1x20xf32> to vector<32x20xf32>
    %192 = vector.shape_cast %187 : vector<1x20xf32> to vector<1x20xf32>
    %193 = vector.broadcast %192 : vector<1x20xf32> to vector<32x20xf32>
    %194 = arith.select %189, %191, %193 : vector<32x20xi1>, vector<32x20xf32>
    %195 = arith.addf %181, %194 : vector<32x20xf32>
    %196 = vector.extract_strided_slice %195 {offsets = [0, 0], sizes = [16, 20], strides = [1, 1]} : vector<32x20xf32> to vector<16x20xf32>
    %197 = vector.extract_strided_slice %195 {offsets = [16, 0], sizes = [16, 20], strides = [1, 1]} : vector<32x20xf32> to vector<16x20xf32>
    %198 = vector.extract_strided_slice %196 {offsets = [0, 0], sizes = [8, 20], strides = [1, 1]} : vector<16x20xf32> to vector<8x20xf32>
    %cst_45 = arith.constant dense<0.000000e+00> : vector<20xf32>
    %199 = vector.multi_reduction <add>, %198, %cst_45 [0] : vector<8x20xf32> to vector<20xf32>
    %200 = vector.shape_cast %199 : vector<20xf32> to vector<1x20xf32>
    %cst_46 = arith.constant 8.000000e+00 : f32
    %201 = vector.broadcast %cst_46 : f32 to vector<1x20xf32>
    %202 = arith.divf %200, %201 : vector<1x20xf32>
    %203 = vector.extract_strided_slice %196 {offsets = [8, 0], sizes = [8, 20], strides = [1, 1]} : vector<16x20xf32> to vector<8x20xf32>
    %cst_47 = arith.constant dense<0.000000e+00> : vector<20xf32>
    %204 = vector.multi_reduction <add>, %203, %cst_47 [0] : vector<8x20xf32> to vector<20xf32>
    %205 = vector.shape_cast %204 : vector<20xf32> to vector<1x20xf32>
    %cst_48 = arith.constant 8.000000e+00 : f32
    %206 = vector.broadcast %cst_48 : f32 to vector<1x20xf32>
    %207 = arith.divf %205, %206 : vector<1x20xf32>
    %208 = tpu.concatenate %202, %207 in 0 : vector<1x20xf32>, vector<1x20xf32> -> vector<2x20xf32>
    %209 = vector.shape_cast %197 : vector<16x20xf32> to vector<2x8x20xf32>
    %c96_49 = arith.constant 96 : index
    %c0_50 = arith.constant 0 : index
    %210 = vector.load %arg2[%c96_49, %c0_50] : memref<104x128xf32, #tpu.memory_space<vmem>>, vector<1x20xf32>
    %211 = vector.shape_cast %210 : vector<1x20xf32> to vector<20xf32>
    %c97 = arith.constant 97 : index
    %c0_51 = arith.constant 0 : index
    %212 = vector.load %arg2[%c97, %c0_51] : memref<104x128xf32, #tpu.memory_space<vmem>>, vector<1x1xf32>
    %213 = vector.shape_cast %212 : vector<1x1xf32> to vector<1xf32>
    %214 = vector.shape_cast %211 : vector<20xf32> to vector<1x1x20xf32>
    %215 = vector.broadcast %214 : vector<1x1x20xf32> to vector<2x8x20xf32>
    %216 = arith.mulf %209, %215 : vector<2x8x20xf32>
    %cst_52 = arith.constant dense<0.000000e+00> : vector<2x8xf32>
    %217 = vector.multi_reduction <add>, %216, %cst_52 [2] : vector<2x8x20xf32> to vector<2x8xf32>
    %218 = vector.shape_cast %213 : vector<1xf32> to vector<1x1xf32>
    %219 = vector.broadcast %218 : vector<1x1xf32> to vector<2x8xf32>
    %220 = arith.addf %217, %219 : vector<2x8xf32>
    %cst_53 = arith.constant 0.000000e+00 : f32
    %221 = vector.broadcast %cst_53 : f32 to vector<2x8xf32>
    %222 = arith.cmpf ogt, %220, %221 : vector<2x8xf32>
    %223 = arith.extui %222 : vector<2x8xi1> to vector<2x8xi32>
    %224 = arith.sitofp %223 : vector<2x8xi32> to vector<2x8xf32>
    %225 = vector.shape_cast %0 : vector<16x20xf32> to vector<2x8x20xf32>
    %226 = vector.shape_cast %1 : vector<16x20xf32> to vector<2x8x20xf32>
    %227 = vector.shape_cast %224 : vector<2x8xf32> to vector<2x8x1xf32>
    %228 = tpu.iota {dimensions = array<i32: 2>} : vector<2x8x20xi32>
    %c4_i32 = arith.constant 4 : i32
    %229 = vector.broadcast %c4_i32 : i32 to vector<2x8x20xi32>
    %230 = arith.cmpi slt, %228, %229 : vector<2x8x20xi32>
    %231 = vector.broadcast %227 : vector<2x8x1xf32> to vector<2x8x20xf32>
    %232 = arith.mulf %225, %231 : vector<2x8x20xf32>
    %cst_54 = arith.constant 1.000000e+00 : f32
    %233 = vector.broadcast %cst_54 : f32 to vector<2x8x1xf32>
    %234 = arith.subf %233, %227 : vector<2x8x1xf32>
    %235 = vector.broadcast %234 : vector<2x8x1xf32> to vector<2x8x20xf32>
    %236 = arith.mulf %235, %226 : vector<2x8x20xf32>
    %237 = arith.addf %232, %236 : vector<2x8x20xf32>
    %238 = arith.select %230, %237, %225 : vector<2x8x20xi1>, vector<2x8x20xf32>
    %239 = vector.shape_cast %238 : vector<2x8x20xf32> to vector<16x20xf32>
    %cst_55 = arith.constant dense<0.000000e+00> : vector<16xf32>
    %240 = vector.multi_reduction <add>, %239, %cst_55 [1] : vector<16x20xf32> to vector<16xf32>
    %241 = vector.shape_cast %240 : vector<16xf32> to vector<16x1xf32>
    %cst_56 = arith.constant 2.000000e+01 : f32
    %242 = vector.broadcast %cst_56 : f32 to vector<16x1xf32>
    %243 = arith.divf %241, %242 : vector<16x1xf32>
    %244 = vector.broadcast %243 : vector<16x1xf32> to vector<16x20xf32>
    %245 = arith.subf %239, %244 : vector<16x20xf32>
    %246 = arith.mulf %245, %245 : vector<16x20xf32>
    %cst_57 = arith.constant dense<0.000000e+00> : vector<16xf32>
    %247 = vector.multi_reduction <add>, %246, %cst_57 [1] : vector<16x20xf32> to vector<16xf32>
    %248 = vector.shape_cast %247 : vector<16xf32> to vector<16x1xf32>
    %cst_58 = arith.constant 2.000000e+01 : f32
    %249 = vector.broadcast %cst_58 : f32 to vector<16x1xf32>
    %250 = arith.divf %248, %249 : vector<16x1xf32>
    %251 = vector.broadcast %243 : vector<16x1xf32> to vector<16x20xf32>
    %252 = arith.subf %239, %251 : vector<16x20xf32>
    %cst_59 = arith.constant 9.99999974E-6 : f32
    %253 = vector.broadcast %cst_59 : f32 to vector<16x1xf32>
    %254 = arith.addf %250, %253 : vector<16x1xf32>
    %255 = math.rsqrt %254 : vector<16x1xf32>
    %256 = vector.broadcast %255 : vector<16x1xf32> to vector<16x20xf32>
    %257 = arith.mulf %252, %256 : vector<16x20xf32>
    %c0_60 = arith.constant 0 : index
    %c128 = arith.constant 128 : index
    %258 = vector.load %arg1[%c0_60, %c128] : memref<20x640xf32, #tpu.memory_space<vmem>>, vector<20x60xf32>
    %cst_61 = arith.constant dense<0.000000e+00> : vector<16x60xf32>
    %259 = tpu.matmul %257, %258, %cst_61 {dimension_numbers = #tpu.dot_dimension_numbers<[1], [0], [0], [1], [0, 0, 1, 1], [], []>} : vector<16x20xf32>, vector<20x60xf32>, vector<16x60xf32> -> vector<16x60xf32>
    %260 = vector.extract_strided_slice %259 {offsets = [0, 0], sizes = [16, 20], strides = [1, 1]} : vector<16x60xf32> to vector<16x20xf32>
    %261 = vector.shape_cast %260 : vector<16x20xf32> to vector<2x8x20xf32>
    %262 = vector.extract_strided_slice %259 {offsets = [0, 20], sizes = [16, 20], strides = [1, 1]} : vector<16x60xf32> to vector<16x20xf32>
    %263 = vector.shape_cast %262 : vector<16x20xf32> to vector<2x8x20xf32>
    %264 = vector.extract_strided_slice %259 {offsets = [0, 40], sizes = [16, 20], strides = [1, 1]} : vector<16x60xf32> to vector<16x20xf32>
    %265 = vector.shape_cast %264 : vector<16x20xf32> to vector<2x8x20xf32>
    "tpu.trace_start"() <{level = 10 : i32, message = "bqd,bkd->bqk"}> : () -> ()
    %cst_62 = arith.constant dense<0.000000e+00> : vector<2x8x8xf32>
    %266 = tpu.matmul %261, %263, %cst_62 {dimension_numbers = #tpu.dot_dimension_numbers<[2], [2], [1], [1], [0, 0, 0, 1, 1, 1], [0], [0]>} : vector<2x8x20xf32>, vector<2x8x20xf32>, vector<2x8x8xf32> -> vector<2x8x8xf32>
    "tpu.trace_stop"() : () -> ()
    %cst_63 = arith.constant 0.223606795 : f32
    %267 = vector.broadcast %cst_63 : f32 to vector<2x8x8xf32>
    %268 = arith.mulf %266, %267 : vector<2x8x8xf32>
    %269 = vector.shape_cast %224 : vector<2x8xf32> to vector<2x8x1xf32>
    %270 = vector.shape_cast %224 : vector<2x8xf32> to vector<2x1x8xf32>
    %271 = vector.broadcast %269 : vector<2x8x1xf32> to vector<2x8x8xf32>
    %272 = vector.broadcast %270 : vector<2x1x8xf32> to vector<2x8x8xf32>
    %273 = arith.mulf %271, %272 : vector<2x8x8xf32>
    %cst_64 = arith.constant 5.000000e-01 : f32
    %274 = vector.broadcast %cst_64 : f32 to vector<2x8x8xf32>
    %275 = arith.cmpf ogt, %273, %274 : vector<2x8x8xf32>
    %cst_65 = arith.constant -1.000000e+09 : f32
    %276 = vector.broadcast %cst_65 : f32 to vector<2x8x8xf32>
    %277 = arith.select %275, %268, %276 : vector<2x8x8xi1>, vector<2x8x8xf32>
    %cst_66 = arith.constant dense<0xFF800000> : vector<2x8xf32>
    %278 = vector.multi_reduction <maximumf>, %277, %cst_66 [2] : vector<2x8x8xf32> to vector<2x8xf32>
    %279 = vector.shape_cast %278 : vector<2x8xf32> to vector<2x8x1xf32>
    %280 = vector.broadcast %279 : vector<2x8x1xf32> to vector<2x8x8xf32>
    %281 = arith.subf %277, %280 : vector<2x8x8xf32>
    %282 = math.exp %281 : vector<2x8x8xf32>
    %cst_67 = arith.constant dense<0.000000e+00> : vector<2x8xf32>
    %283 = vector.multi_reduction <add>, %282, %cst_67 [2] : vector<2x8x8xf32> to vector<2x8xf32>
    %284 = vector.shape_cast %283 : vector<2x8xf32> to vector<2x8x1xf32>
    %285 = tpu.reciprocal %284 {approx = true} : vector<2x8x1xf32> -> vector<2x8x1xf32>
    %286 = vector.broadcast %285 : vector<2x8x1xf32> to vector<2x8x8xf32>
    %287 = arith.mulf %282, %286 : vector<2x8x8xf32>
    "tpu.trace_start"() <{level = 10 : i32, message = "bqk,bkd->bqd"}> : () -> ()
    %cst_68 = arith.constant dense<0.000000e+00> : vector<2x8x20xf32>
    %288 = tpu.matmul %287, %265, %cst_68 {dimension_numbers = #tpu.dot_dimension_numbers<[2], [1], [1], [2], [0, 0, 0, 1, 1, 2], [0], [0]>} : vector<2x8x8xf32>, vector<2x8x20xf32>, vector<2x8x20xf32> -> vector<2x8x20xf32>
    "tpu.trace_stop"() : () -> ()
    %289 = vector.shape_cast %288 : vector<2x8x20xf32> to vector<16x20xf32>
    %c0_69 = arith.constant 0 : index
    %c232 = arith.constant 232 : index
    %290 = vector.load %arg1[%c0_69, %c232] : memref<20x640xf32, #tpu.memory_space<vmem>>, vector<20x20xf32>
    %cst_70 = arith.constant dense<0.000000e+00> : vector<16x20xf32>
    %291 = tpu.matmul %289, %290, %cst_70 {dimension_numbers = #tpu.dot_dimension_numbers<[1], [0], [0], [1], [0, 0, 1, 1], [], []>} : vector<16x20xf32>, vector<20x20xf32>, vector<16x20xf32> -> vector<16x20xf32>
    %292 = arith.addf %257, %291 : vector<16x20xf32>
    %cst_71 = arith.constant dense<0.000000e+00> : vector<16xf32>
    %293 = vector.multi_reduction <add>, %292, %cst_71 [1] : vector<16x20xf32> to vector<16xf32>
    %294 = vector.shape_cast %293 : vector<16xf32> to vector<16x1xf32>
    %cst_72 = arith.constant 2.000000e+01 : f32
    %295 = vector.broadcast %cst_72 : f32 to vector<16x1xf32>
    %296 = arith.divf %294, %295 : vector<16x1xf32>
    %297 = vector.broadcast %296 : vector<16x1xf32> to vector<16x20xf32>
    %298 = arith.subf %292, %297 : vector<16x20xf32>
    %299 = arith.mulf %298, %298 : vector<16x20xf32>
    %cst_73 = arith.constant dense<0.000000e+00> : vector<16xf32>
    %300 = vector.multi_reduction <add>, %299, %cst_73 [1] : vector<16x20xf32> to vector<16xf32>
    %301 = vector.shape_cast %300 : vector<16xf32> to vector<16x1xf32>
    %cst_74 = arith.constant 2.000000e+01 : f32
    %302 = vector.broadcast %cst_74 : f32 to vector<16x1xf32>
    %303 = arith.divf %301, %302 : vector<16x1xf32>
    %304 = vector.broadcast %296 : vector<16x1xf32> to vector<16x20xf32>
    %305 = arith.subf %292, %304 : vector<16x20xf32>
    %cst_75 = arith.constant 9.99999974E-6 : f32
    %306 = vector.broadcast %cst_75 : f32 to vector<16x1xf32>
    %307 = arith.addf %303, %306 : vector<16x1xf32>
    %308 = math.rsqrt %307 : vector<16x1xf32>
    %309 = vector.broadcast %308 : vector<16x1xf32> to vector<16x20xf32>
    %310 = arith.mulf %305, %309 : vector<16x20xf32>
    %c88 = arith.constant 88 : index
    %c0_76 = arith.constant 0 : index
    %311 = vector.load %arg2[%c88, %c0_76] : memref<104x128xf32, #tpu.memory_space<vmem>>, vector<1x20xf32>
    %312 = vector.shape_cast %311 : vector<1x20xf32> to vector<20xf32>
    %313 = vector.shape_cast %312 : vector<20xf32> to vector<1x20xf32>
    %314 = vector.broadcast %313 : vector<1x20xf32> to vector<16x20xf32>
    %315 = arith.mulf %310, %314 : vector<16x20xf32>
    %c89 = arith.constant 89 : index
    %c0_77 = arith.constant 0 : index
    %316 = vector.load %arg2[%c89, %c0_77] : memref<104x128xf32, #tpu.memory_space<vmem>>, vector<1x20xf32>
    %317 = vector.shape_cast %316 : vector<1x20xf32> to vector<20xf32>
    %318 = vector.shape_cast %317 : vector<20xf32> to vector<1x20xf32>
    %319 = vector.broadcast %318 : vector<1x20xf32> to vector<16x20xf32>
    %320 = arith.addf %315, %319 : vector<16x20xf32>
    %c0_78 = arith.constant 0 : index
    %c512 = arith.constant 512 : index
    %321 = vector.load %arg1[%c0_78, %c512] : memref<20x640xf32, #tpu.memory_space<vmem>>, vector<20x72xf32>
    %cst_79 = arith.constant dense<0.000000e+00> : vector<16x72xf32>
    %322 = tpu.matmul %320, %321, %cst_79 {dimension_numbers = #tpu.dot_dimension_numbers<[1], [0], [0], [1], [0, 0, 1, 1], [], []>} : vector<16x20xf32>, vector<20x72xf32>, vector<16x72xf32> -> vector<16x72xf32>
    %c90 = arith.constant 90 : index
    %c0_80 = arith.constant 0 : index
    %323 = vector.load %arg2[%c90, %c0_80] : memref<104x128xf32, #tpu.memory_space<vmem>>, vector<1x72xf32>
    %324 = vector.shape_cast %323 : vector<1x72xf32> to vector<72xf32>
    %325 = vector.shape_cast %324 : vector<72xf32> to vector<1x72xf32>
    %326 = vector.broadcast %325 : vector<1x72xf32> to vector<16x72xf32>
    %327 = arith.addf %322, %326 : vector<16x72xf32>
    %cst_81 = arith.constant 0.000000e+00 : f32
    %328 = vector.broadcast %cst_81 : f32 to vector<16x72xf32>
    %329 = arith.maximumf %327, %328 : vector<16x72xf32>
    %c0_82 = arith.constant 0 : index
    %c40 = arith.constant 40 : index
    %330 = vector.load %arg2[%c0_82, %c40] : memref<104x128xf32, #tpu.memory_space<vmem>>, vector<72x20xf32>
    %cst_83 = arith.constant dense<0.000000e+00> : vector<16x20xf32>
    %331 = tpu.matmul %329, %330, %cst_83 {dimension_numbers = #tpu.dot_dimension_numbers<[1], [0], [0], [1], [0, 0, 1, 1], [], []>} : vector<16x72xf32>, vector<72x20xf32>, vector<16x20xf32> -> vector<16x20xf32>
    %c91 = arith.constant 91 : index
    %c0_84 = arith.constant 0 : index
    %332 = vector.load %arg2[%c91, %c0_84] : memref<104x128xf32, #tpu.memory_space<vmem>>, vector<1x20xf32>
    %333 = vector.shape_cast %332 : vector<1x20xf32> to vector<20xf32>
    %334 = vector.shape_cast %333 : vector<20xf32> to vector<1x20xf32>
    %335 = vector.broadcast %334 : vector<1x20xf32> to vector<16x20xf32>
    %336 = arith.addf %331, %335 : vector<16x20xf32>
    %337 = arith.addf %320, %336 : vector<16x20xf32>
    %cst_85 = arith.constant dense<0.000000e+00> : vector<16xf32>
    %338 = vector.multi_reduction <add>, %337, %cst_85 [1] : vector<16x20xf32> to vector<16xf32>
    %339 = vector.shape_cast %338 : vector<16xf32> to vector<16x1xf32>
    %cst_86 = arith.constant 2.000000e+01 : f32
    %340 = vector.broadcast %cst_86 : f32 to vector<16x1xf32>
    %341 = arith.divf %339, %340 : vector<16x1xf32>
    %342 = vector.broadcast %341 : vector<16x1xf32> to vector<16x20xf32>
    %343 = arith.subf %337, %342 : vector<16x20xf32>
    %344 = arith.mulf %343, %343 : vector<16x20xf32>
    %cst_87 = arith.constant dense<0.000000e+00> : vector<16xf32>
    %345 = vector.multi_reduction <add>, %344, %cst_87 [1] : vector<16x20xf32> to vector<16xf32>
    %346 = vector.shape_cast %345 : vector<16xf32> to vector<16x1xf32>
    %cst_88 = arith.constant 2.000000e+01 : f32
    %347 = vector.broadcast %cst_88 : f32 to vector<16x1xf32>
    %348 = arith.divf %346, %347 : vector<16x1xf32>
    %349 = vector.broadcast %341 : vector<16x1xf32> to vector<16x20xf32>
    %350 = arith.subf %337, %349 : vector<16x20xf32>
    %cst_89 = arith.constant 9.99999974E-6 : f32
    %351 = vector.broadcast %cst_89 : f32 to vector<16x1xf32>
    %352 = arith.addf %348, %351 : vector<16x1xf32>
    %353 = math.rsqrt %352 : vector<16x1xf32>
    %354 = vector.broadcast %353 : vector<16x1xf32> to vector<16x20xf32>
    %355 = arith.mulf %350, %354 : vector<16x20xf32>
    %c92 = arith.constant 92 : index
    %c0_90 = arith.constant 0 : index
    %356 = vector.load %arg2[%c92, %c0_90] : memref<104x128xf32, #tpu.memory_space<vmem>>, vector<1x20xf32>
    %357 = vector.shape_cast %356 : vector<1x20xf32> to vector<20xf32>
    %358 = vector.shape_cast %357 : vector<20xf32> to vector<1x20xf32>
    %359 = vector.broadcast %358 : vector<1x20xf32> to vector<16x20xf32>
    %360 = arith.mulf %355, %359 : vector<16x20xf32>
    %c93 = arith.constant 93 : index
    %c0_91 = arith.constant 0 : index
    %361 = vector.load %arg2[%c93, %c0_91] : memref<104x128xf32, #tpu.memory_space<vmem>>, vector<1x20xf32>
    %362 = vector.shape_cast %361 : vector<1x20xf32> to vector<20xf32>
    %363 = vector.shape_cast %362 : vector<20xf32> to vector<1x20xf32>
    %364 = vector.broadcast %363 : vector<1x20xf32> to vector<16x20xf32>
    %365 = arith.addf %360, %364 : vector<16x20xf32>
    %366 = vector.extract_strided_slice %365 {offsets = [0, 0], sizes = [8, 20], strides = [1, 1]} : vector<16x20xf32> to vector<8x20xf32>
    %cst_92 = arith.constant dense<0.000000e+00> : vector<20xf32>
    %367 = vector.multi_reduction <add>, %366, %cst_92 [0] : vector<8x20xf32> to vector<20xf32>
    %368 = vector.shape_cast %367 : vector<20xf32> to vector<1x20xf32>
    %cst_93 = arith.constant 8.000000e+00 : f32
    %369 = vector.broadcast %cst_93 : f32 to vector<1x20xf32>
    %370 = arith.divf %368, %369 : vector<1x20xf32>
    %371 = vector.extract_strided_slice %365 {offsets = [8, 0], sizes = [8, 20], strides = [1, 1]} : vector<16x20xf32> to vector<8x20xf32>
    %cst_94 = arith.constant dense<0.000000e+00> : vector<20xf32>
    %372 = vector.multi_reduction <add>, %371, %cst_94 [0] : vector<8x20xf32> to vector<20xf32>
    %373 = vector.shape_cast %372 : vector<20xf32> to vector<1x20xf32>
    %cst_95 = arith.constant 8.000000e+00 : f32
    %374 = vector.broadcast %cst_95 : f32 to vector<1x20xf32>
    %375 = arith.divf %373, %374 : vector<1x20xf32>
    %376 = tpu.concatenate %370, %375 in 0 : vector<1x20xf32>, vector<1x20xf32> -> vector<2x20xf32>
    %c78 = arith.constant 78 : index
    %c0_96 = arith.constant 0 : index
    %377 = vector.load %arg2[%c78, %c0_96] : memref<104x128xf32, #tpu.memory_space<vmem>>, vector<1x3xf32>
    %378 = vector.shape_cast %377 : vector<1x3xf32> to vector<3xf32>
    %c98 = arith.constant 98 : index
    %c0_97 = arith.constant 0 : index
    %379 = vector.load %arg2[%c98, %c0_97] : memref<104x128xf32, #tpu.memory_space<vmem>>, vector<1x20xf32>
    %380 = vector.shape_cast %379 : vector<1x20xf32> to vector<20xf32>
    %381 = vector.shape_cast %380 : vector<20xf32> to vector<1x20xf32>
    %382 = vector.broadcast %381 : vector<1x20xf32> to vector<2x20xf32>
    %383 = arith.mulf %208, %382 : vector<2x20xf32>
    %cst_98 = arith.constant dense<0.000000e+00> : vector<2xf32>
    %384 = vector.multi_reduction <add>, %383, %cst_98 [1] : vector<2x20xf32> to vector<2xf32>
    %385 = vector.shape_cast %384 : vector<2xf32> to vector<2x1xf32>
    %c99 = arith.constant 99 : index
    %c0_99 = arith.constant 0 : index
    %386 = vector.load %arg2[%c99, %c0_99] : memref<104x128xf32, #tpu.memory_space<vmem>>, vector<1x20xf32>
    %387 = vector.shape_cast %386 : vector<1x20xf32> to vector<20xf32>
    %388 = vector.shape_cast %387 : vector<20xf32> to vector<1x20xf32>
    %389 = vector.broadcast %388 : vector<1x20xf32> to vector<2x20xf32>
    %390 = arith.mulf %208, %389 : vector<2x20xf32>
    %cst_100 = arith.constant dense<0.000000e+00> : vector<2xf32>
    %391 = vector.multi_reduction <add>, %390, %cst_100 [1] : vector<2x20xf32> to vector<2xf32>
    %392 = vector.shape_cast %391 : vector<2xf32> to vector<2x1xf32>
    %c100 = arith.constant 100 : index
    %c0_101 = arith.constant 0 : index
    %393 = vector.load %arg2[%c100, %c0_101] : memref<104x128xf32, #tpu.memory_space<vmem>>, vector<1x20xf32>
    %394 = vector.shape_cast %393 : vector<1x20xf32> to vector<20xf32>
    %395 = vector.shape_cast %394 : vector<20xf32> to vector<1x20xf32>
    %396 = vector.broadcast %395 : vector<1x20xf32> to vector<2x20xf32>
    %397 = arith.mulf %208, %396 : vector<2x20xf32>
    %cst_102 = arith.constant dense<0.000000e+00> : vector<2xf32>
    %398 = vector.multi_reduction <add>, %397, %cst_102 [1] : vector<2x20xf32> to vector<2xf32>
    %399 = vector.shape_cast %398 : vector<2xf32> to vector<2x1xf32>
    %400 = tpu.concatenate %385, %392, %399 in 1 : vector<2x1xf32>, vector<2x1xf32>, vector<2x1xf32> -> vector<2x3xf32>
    %401 = vector.shape_cast %378 : vector<3xf32> to vector<1x3xf32>
    %402 = vector.broadcast %401 : vector<1x3xf32> to vector<2x3xf32>
    %403 = arith.addf %400, %402 : vector<2x3xf32>
    %c94 = arith.constant 94 : index
    %c0_103 = arith.constant 0 : index
    %404 = vector.load %arg2[%c94, %c0_103] : memref<104x128xf32, #tpu.memory_space<vmem>>, vector<1x3xf32>
    %405 = vector.shape_cast %404 : vector<1x3xf32> to vector<3xf32>
    %c101 = arith.constant 101 : index
    %c0_104 = arith.constant 0 : index
    %406 = vector.load %arg2[%c101, %c0_104] : memref<104x128xf32, #tpu.memory_space<vmem>>, vector<1x20xf32>
    %407 = vector.shape_cast %406 : vector<1x20xf32> to vector<20xf32>
    %408 = vector.shape_cast %407 : vector<20xf32> to vector<1x20xf32>
    %409 = vector.broadcast %408 : vector<1x20xf32> to vector<2x20xf32>
    %410 = arith.mulf %376, %409 : vector<2x20xf32>
    %cst_105 = arith.constant dense<0.000000e+00> : vector<2xf32>
    %411 = vector.multi_reduction <add>, %410, %cst_105 [1] : vector<2x20xf32> to vector<2xf32>
    %412 = vector.shape_cast %411 : vector<2xf32> to vector<2x1xf32>
    %c102 = arith.constant 102 : index
    %c0_106 = arith.constant 0 : index
    %413 = vector.load %arg2[%c102, %c0_106] : memref<104x128xf32, #tpu.memory_space<vmem>>, vector<1x20xf32>
    %414 = vector.shape_cast %413 : vector<1x20xf32> to vector<20xf32>
    %415 = vector.shape_cast %414 : vector<20xf32> to vector<1x20xf32>
    %416 = vector.broadcast %415 : vector<1x20xf32> to vector<2x20xf32>
    %417 = arith.mulf %376, %416 : vector<2x20xf32>
    %cst_107 = arith.constant dense<0.000000e+00> : vector<2xf32>
    %418 = vector.multi_reduction <add>, %417, %cst_107 [1] : vector<2x20xf32> to vector<2xf32>
    %419 = vector.shape_cast %418 : vector<2xf32> to vector<2x1xf32>
    %c103 = arith.constant 103 : index
    %c0_108 = arith.constant 0 : index
    %420 = vector.load %arg2[%c103, %c0_108] : memref<104x128xf32, #tpu.memory_space<vmem>>, vector<1x20xf32>
    %421 = vector.shape_cast %420 : vector<1x20xf32> to vector<20xf32>
    %422 = vector.shape_cast %421 : vector<20xf32> to vector<1x20xf32>
    %423 = vector.broadcast %422 : vector<1x20xf32> to vector<2x20xf32>
    %424 = arith.mulf %376, %423 : vector<2x20xf32>
    %cst_109 = arith.constant dense<0.000000e+00> : vector<2xf32>
    %425 = vector.multi_reduction <add>, %424, %cst_109 [1] : vector<2x20xf32> to vector<2xf32>
    %426 = vector.shape_cast %425 : vector<2xf32> to vector<2x1xf32>
    %427 = tpu.concatenate %412, %419, %426 in 1 : vector<2x1xf32>, vector<2x1xf32>, vector<2x1xf32> -> vector<2x3xf32>
    %428 = vector.shape_cast %405 : vector<3xf32> to vector<1x3xf32>
    %429 = vector.broadcast %428 : vector<1x3xf32> to vector<2x3xf32>
    %430 = arith.addf %427, %429 : vector<2x3xf32>
    %cst_110 = arith.constant 0.000000e+00 : f32
    %431 = vector.broadcast %cst_110 : f32 to vector<2x66xf32>
    %432 = tpu.concatenate %403, %430, %208, %376, %220, %224, %431 in 1 : vector<2x3xf32>, vector<2x3xf32>, vector<2x20xf32>, vector<2x20xf32>, vector<2x8xf32>, vector<2x8xf32>, vector<2x66xf32> -> vector<2x128xf32>
    %c0_111 = arith.constant 0 : index
    %c0_112 = arith.constant 0 : index
    %433 = vector.load %arg3[%c0_111, %c0_112] : memref<2x128xf32, #tpu.memory_space<vmem>>, vector<2x128xf32>
    tpu.vector_store %arg3[%c0_111, %c0_112], %432 {strides = array<i32>} : memref<2x128xf32, #tpu.memory_space<vmem>>, vector<2x128xf32>,
    return
  }
}

</mosaic_0001>

<bundles_post_ra>
// kernel: timex_forward.1
= control target key start
LH: loop header
LB: loop body
LE: loop exit
PB: predicated region body
PF: predicated region fallthrough
CT: control target
= control target key end

     0   :  { %vm16_vm0 = vcmask 162816   ;;  %vm53_vm1 = vcmask 1043456   ;;  %s2626_s21 = smov 68   ;;  %s2627_s22 = smov 108   ;;  %vm275_vm3 = vcmask 261120   ;;  %vm819_vm4 = vcmask 588800   ;;  %s3133_s0 = inlined_call_operand.vmem [shape: f32[16,40], index: 0, kind: input, shape index: {}]   ;;  %s3134_s1 = inlined_call_operand.vmem [shape: f32[20,640], index: 1, kind: input, shape index: {}]   ;;  %s3135_s2 = inlined_call_operand.vmem [shape: f32[104,128], index: 2, kind: input, shape index: {}]   ;;  %s3136_s3 = inlined_call_operand.vmem [shape: f32[2,128], index: 3, kind: output, shape index: {}]  }
   0x1   :  { %v2660_v0 = vld [vmem:[%s3133_s0] sm:$0xff]  ;;  %v2665_v1 = vld [vmem:[%s3133_s0 + $0x8] sm:$0xff]  ;;  %v46_v17 = vld [vmem:[%s3134_s1 + $0x50] sm:$0xf]  ;;  %s2628_s27 = smov 32   ;;  %s2629_s5 = smov 88  }
   0x2   :  { %v17_v2 = vsel %vm16_vm0, %v2660_v0, 0.0  ;;  %v20_v3 = vsel %vm16_vm0, %v2665_v1, 0.0  ;;  %v44_v14 = vld [vmem:[%s3134_s1] sm:$0xff]  ;;  %v45_v15 = vld [vmem:[%s3134_s1 + $0x28] sm:$0xff]  ;;  %vm2705_vm2 = vmpackc.low %vm16_vm0, %vm16_vm0  ;;  %s2630_s10 = smov 64   ;;  %vm1388_vm7 = vcmask 1041409  }
   0x3   :  { %18 = vadd.xlane.f32.xlu0 %v17_v2  ;;  %v2431_v16 = vpack.c.bf16 %v45_v15, %v44_v14  ;;  %v252_v39 = vld [vmem:[%s3135_s2 + $0x50] sm:$0xff]  ;;  %v251_v40 = vld [vmem:[%s3135_s2 + $0x48] sm:$0xff]  ;;  %v254_v41 = vld [vmem:[%s3135_s2 + $0x60] sm:$0xff]  ;;  %vm2632_vm9 = vmmov 0   ;;  %vm1415_vm10 = vcmask 64512   ;;  %vm1064_vm13 = vcmask 1040384  }
   0x4   :  { %v253_v42 = vld [vmem:[%s3135_s2 + $0x58] sm:$0xff]  ;;  %vm2020_vm14 = vcmask 156672   ;;  %vm2042_vm15 = vcmask 7168   ;;  %s2635_s24 = smov 3   ;;  %s2636_s25 = smov 26  }
   0x5   :  { %2432 = vmatprep.subr.bf16.mxu1 %v2431_v16 }
   0x6   :  { %2434 = vmatpush3.bf16.msra.mxu1 %v2431_v16 }
   0x7   :  { %21 = vadd.xlane.f32.xlu0 %v20_v3  ;;  %2294 = vmatprep.subr.msk.mxu1 %vm53_vm1, %v46_v17 }
   0xa   :  { %2295 = vmatpush3.msk.msra.mxu1 %vm53_vm1, %v46_v17 }
  0x90   :  { %v19_v4 = vpop.xlane.xlu0 %18 }
  0x91   :  { %v24_v5 = vmul.f32 0.05, %v19_v4 }
  0x93   :  { %v26_v6 = vsub.f32 %v2660_v0, %v24_v5 }
  0x94   :  { %v22_v7 = vpop.xlane.xlu0 %21 }
  0x95   :  { %v25_v8 = vmul.f32 0.05, %v22_v7  ;;  %v28_v9 = vmul.f32 %v26_v6, %v26_v6 }
  0x97   :  { %v27_v10 = vsub.f32 %v2665_v1, %v25_v8  ;;  %v30_v11 = vsel %vm16_vm0, %v28_v9, 0.0 }
  0x98   :  { %31 = vadd.xlane.f32.xlu1 %v30_v11 }
  0x99   :  { %v29_v12 = vmul.f32 %v27_v10, %v27_v10 }
  0x9b   :  { %v33_v13 = vsel %vm16_vm0, %v29_v12, 0.0 }
  0x9c   :  { %34 = vadd.xlane.f32.xlu1 %v33_v13 }
 0x125   :  { %v32_v18 = vpop.xlane.xlu1 %31 }
 0x126   :  { %v36_v19 = vmul.f32 0.05, %v32_v18 }
 0x128   :  { %v38_v20 = vadd.f32 1e-05, %v36_v19 }
 0x129   :  { %v35_v21 = vpop.xlane.xlu1 %34 }
 0x12a   :  { %2570 = vrsqrt.f32 %v38_v20  ;;  %v37_v22 = vmul.f32 0.05, %v35_v21 }
 0x12c   :  { %v39_v23 = vadd.f32 1e-05, %v37_v22 }
 0x12e   :  { %2572 = vrsqrt.f32 %v39_v23 }
 0x134   :  { %v2571_v24 = vpop.eup %2570 }
 0x135   :  { %v2686_v25 = vmul.f32 %v2571_v24, %v26_v6 }
 0x137   :  { %2296 = vmatprep.mubr.msk.f32.mxu1 %vm16_vm0, %v2686_v25 }
 0x138   :  { %v2573_v26 = vpop.eup %2572 }
 0x139   :  { %v2690_v27 = vmul.f32 %v2573_v26, %v27_v10  ;;  %v2747_v26 = vld [vmem:[%s3134_s1 + $0x8] sm:$0xff] }
 0x13b   :  { %2297 = vmatmul.mubr.msk.f32.vlgmr.msra.gmra.mrb[0].mxu1 %vm16_vm0, %v2690_v27 }
 0x20e   :  { %v2298_v28 = vpop.f32.mrb[0].mxu1 }
 0x20f   :  { %136 = vrot.lane.b32.xlu1 %v2298_v28, %s2626_s21  ;;  %v123_v29 = vpop.f32.mrb[1].mxu1 }
 0x210   :  { %134 = vrot.lane.b32.xlu0 %v123_v29, %s2626_s21  ;;  %2307 = vmatprep.mubr.msk.f32.mxu1 %vm16_vm0, %v123_v29  ;;  %v2695_v30 = vpack.i.bf16 %v2298_v28, %v123_v29  ;;  %s2634_s21 = smov 6  }
 0x213   :  { %2521 = vrot.lane.b32.xlu1 %v2695_v30, %s2627_s22 }
 0x214   :  { %259 = vrot.lane.b32.xlu0 %v251_v40, %s2628_s27 }
 0x218   :  { %263 = vrot.lane.b32.xlu0 %v253_v42, %s2628_s27 }
 0x281   :  { %v137_v31 = vpop.permute.xlu1 %136 }
 0x282   :  { %v135_v32 = vpop.permute.xlu0 %134 }
 0x283   :  { %v2699_v33 = vpack.i.bf16 %v137_v31, %v135_v32 }
 0x285   :  { %v2522_v34 = vpop.permute.xlu1 %2521  ;;  %2526 = vrot.lane.b32.xlu1 %v2699_v33, %s2627_s22 }
 0x286   :  { %v2524_v35 = vunpack.i.h.bf16 %v2522_v34  ;;  %v2523_v36 = vunpack.i.l.bf16 %v2522_v34  ;;  %v260_v47 = vpop.permute.xlu0 %259 }
 0x288   :  { %v2435_v38 = vpack.c.bf16 %v2524_v35, %v2523_v36 }
 0x289   :  { %261 = vrot.lane.b32.xlu1 %v252_v39, %s2628_s27 }
 0x28a   :  { %2437 = vmatprep.subr.msk.bf16.mxu1 %vm2705_vm2, %v2435_v38  ;;  %v264_v58 = vpop.permute.xlu0 %263 }
 0x28b   :  { %2440 = vmatpush3.bf16.xpose.msk.msra.mxu1 %vm2705_vm2, %v2435_v38 }
 0x28d   :  { %265 = vrot.lane.b32.xlu1 %v254_v41, %s2628_s27 }
 0x2f7   :  { %v2527_v43 = vpop.permute.xlu1 %2526 }
 0x2f8   :  { %v2529_v44 = vunpack.i.h.bf16 %v2527_v43  ;;  %v2528_v45 = vunpack.i.l.bf16 %v2527_v43 }
 0x2fa   :  { %v2441_v46 = vpack.c.bf16 %v2529_v44, %v2528_v45 }
 0x2fb   :  { %v262_v49 = vpop.permute.xlu1 %261 }
 0x2fc   :  { %2443 = vmatprep.subr.msk.bf16.mxu1 %vm2705_vm2, %v2441_v46 }
 0x2fd   :  { %2446 = vmatpush3.bf16.xpose.msk.msra.mxu1 %vm2705_vm2, %v2441_v46  ;;  %vm2124_vm2 = vcmask 48128  }
 0x2ff   :  { %v266_v62 = vpop.permute.xlu1 %265 }
 0x304   :  { %2308 = vmatmul.mubr.msk.f32.vlgmr.msra.gmra.mrb[2].mxu1 %vm16_vm0, %v2298_v28  ;;  %v2752_v28 = vld [vmem:[%s3134_s1 + $0x30] sm:$0xff] }
 0x305   :  { %2310 = vmatprep.mubr.msk.f32.mxu1 %vm16_vm0, %v135_v32  ;;  %v2756_v29 = vpack.i.bf16 %v2752_v28, %v2747_v26 }
 0x308   :  { %2311 = vmatmul.mubr.msk.f32.gmra.mrb[4].mxu1 %vm16_vm0, %v137_v31 }
 0x3d7   :  { %v2309_v48 = vpop.f32.mrb[2].mxu1 }
 0x3d8   :  { %v248_v50 = vmul.f32 0.2236068, %v2309_v48  ;;  %v228_v51 = vpop.f32.mrb[3].mxu1 }
 0x3d9   :  { %v247_v52 = vmul.f32 0.2236068, %v228_v51 }
 0x3da   :  { %v272_v53 = vadd.f32 %v262_v49, %v248_v50 }
 0x3db   :  { %v271_v54 = vadd.f32 %v260_v47, %v247_v52  ;;  %v2312_v55 = vpop.f32.mrb[4].mxu1 }
 0x3dc   :  { %v238_v56 = vpop.f32.mrb[5].mxu1  ;;  %v279_v57 = vsel %vm275_vm3, %v272_v53, -inf  ;;  %v250_v59 = vmul.f32 0.2236068, %v2312_v55 }
 0x3dd   :  { %v249_v60 = vmul.f32 0.2236068, %v238_v56  ;;  %280 = vmax.xlane.f32.xlu1 %v279_v57  ;;  %v276_v61 = vsel %vm275_vm3, %v271_v54, -inf }
 0x3de   :  { %277 = vmax.xlane.f32.xlu0 %v276_v61  ;;  %v274_v2 = vadd.f32 %v266_v62, %v250_v59 }
 0x3df   :  { %v273_v63 = vadd.f32 %v264_v58, %v249_v60 }
 0x3e0   :  { %v285_v4 = vsel %vm275_vm3, %v274_v2, -inf }
 0x3e1   :  { %v282_v3 = vsel %vm275_vm3, %v273_v63, -inf }
 0x3e2   :  { %283 = vmax.xlane.f32.xlu0 %v282_v3 }
 0x3e6   :  { %286 = vmax.xlane.f32.xlu0 %v285_v4 }
 0x46a   :  { %v281_v5 = vpop.xlane.xlu1 %280 }
 0x46b   :  { %v289_v6 = vsub.f32 %v272_v53, %v281_v5  ;;  %v278_v7 = vpop.xlane.xlu0 %277 }
 0x46c   :  { %v288_v8 = vsub.f32 %v271_v54, %v278_v7 }
 0x46d   :  { %v294_v9 = vmul.f32 1.442695, %v289_v6 }
 0x46e   :  { %v292_v10 = vmul.f32 1.442695, %v288_v8 }
 0x46f   :  { %2574 = vpow2.f32 %v294_v9  ;;  %v284_v11 = vpop.xlane.xlu0 %283 }
 0x470   :  { %2576 = vpow2.f32 %v292_v10  ;;  %v290_v12 = vsub.f32 %v273_v63, %v284_v11 }
 0x472   :  { %v296_v13 = vmul.f32 1.442695, %v290_v12 }
 0x473   :  { %v287_v14 = vpop.xlane.xlu0 %286 }
 0x474   :  { %2578 = vpow2.f32 %v296_v13  ;;  %v291_v15 = vsub.f32 %v274_v2, %v287_v14 }
 0x476   :  { %v298_v16 = vmul.f32 1.442695, %v291_v15 }
 0x478   :  { %2580 = vpow2.f32 %v298_v16 }
 0x479   :  { %v2575_v17 = vpop.eup %2574 }
 0x47a   :  { %v2577_v18 = vpop.eup %2576  ;;  %v303_v19 = vsel %vm275_vm3, %v2575_v17, 0.0 }
 0x47b   :  { %304 = vadd.xlane.f32.xlu1 %v303_v19  ;;  %v300_v20 = vsel %vm275_vm3, %v2577_v18, 0.0 }
 0x47c   :  { %301 = vadd.xlane.f32.xlu0 %v300_v20 }
 0x47e   :  { %v2579_v21 = vpop.eup %2578 }
 0x47f   :  { %v306_v22 = vsel %vm275_vm3, %v2579_v21, 0.0 }
 0x480   :  { %307 = vadd.xlane.f32.xlu0 %v306_v22 }
 0x482   :  { %v2581_v23 = vpop.eup %2580 }
 0x483   :  { %v309_v24 = vsel %vm275_vm3, %v2581_v23, 0.0 }
 0x484   :  { %310 = vadd.xlane.f32.xlu1 %v309_v24  ;;  %v673_v24 = vld [vmem:[%s3134_s1 + $0x38] sm:$0xff] }
 0x495   :  { %2536 = vrot.lane.b32.xlu1 %v2699_v33, %s2629_s5 }
 0x496   :  { %2531 = vrot.lane.b32.xlu0 %v2695_v30, %s2629_s5  ;;  %v2762_v30 = vld [vmem:[%s3134_s1 + $0x58] sm:$0xf] }
 0x499   :  { %2541 = vrot.lane.b32.xlu1 %v2756_v29, %s2630_s10 }
 0x49d   :  { %448 = vrot.lane.b32.xlu1 %v2762_v30, %s2630_s10 }
 0x508   :  { %v305_v32 = vpop.xlane.xlu1 %304 }
 0x509   :  { %v302_v31 = vpop.xlane.xlu0 %301 }
 0x50a   :  { %2582 = vrcp.f32 %v302_v31 }
 0x50b   :  { %2584 = vrcp.f32 %v305_v32  ;;  %v676_v32 = vld [vmem:[%s3134_s1 + $0x68] sm:$0xf] }
 0x50d   :  { %v308_v33 = vpop.xlane.xlu0 %307 }
 0x50e   :  { %2586 = vrcp.f32 %v308_v33  ;;  %v675_v33 = vld [vmem:[%s3134_s1 + $0x60] sm:$0xf] }
 0x511   :  { %v311_v34 = vpop.xlane.xlu1 %310  ;;  %v2532_v35 = vpop.permute.xlu0 %2531 }
 0x512   :  { %v2534_v36 = vunpack.i.h.bf16 %v2532_v35  ;;  %v2533_v37 = vunpack.i.l.bf16 %v2532_v35  ;;  %2588 = vrcp.f32 %v311_v34  ;;  %v2631_v34 = vmov 0.0  }
 0x514   :  { %v2583_v38 = vpop.eup %2582  ;;  %v2447_v39 = vpack.c.bf16 %v2534_v36, %v2533_v37 }
 0x515   :  { %v2537_v40 = vpop.permute.xlu1 %2536  ;;  %v316_v41 = vmul.f32 %v2583_v38, %v2577_v18  ;;  %v2585_v45 = vpop.eup %2584 }
 0x516   :  { %v2539_v42 = vunpack.i.h.bf16 %v2537_v40  ;;  %v2538_v43 = vunpack.i.l.bf16 %v2537_v40  ;;  %2448 = vmatprep.subr.bf16.mxu0 %v2447_v39  ;;  %v317_v50 = vmul.f32 %v2585_v45, %v2575_v17  ;;  %v2813_v45 = vld [vmem:[%s3135_s2] sm:$0xff] }
 0x517   :  { %2450 = vmatpush3.bf16.msra.mxu0 %v2447_v39  ;;  %2321 = vmatprep.mubr.msk.f32.mxu0 %vm275_vm3, %v316_v41 }
 0x518   :  { %v2451_v44 = vpack.c.bf16 %v2539_v42, %v2538_v43  ;;  %v2587_v47 = vpop.eup %2586 }
 0x519   :  { %v2542_v46 = vpop.permute.xlu1 %2541  ;;  %v318_v53 = vmul.f32 %v2587_v47, %v2579_v21  ;;  %v674_v21 = vld [vmem:[%s3134_s1 + $0x40] sm:$0xff] }
 0x51a   :  { %2452 = vmatprep.subr.bf16.mxu0 %v2451_v44  ;;  %v2544_v48 = vunpack.i.h.bf16 %v2542_v46  ;;  %v2543_v49 = vunpack.i.l.bf16 %v2542_v46  ;;  %v2818_v46 = vld [vmem:[%s3135_s2 + $0x8] sm:$0xff] }
 0x51b   :  { %2454 = vmatpush3.bf16.msra.mxu0 %v2451_v44  ;;  %v2463_v47 = vpack.c.bf16 %v2818_v46, %v2813_v45 }
 0x51c   :  { %v2455_v51 = vpack.c.bf16 %v2544_v48, %v2543_v49  ;;  %v2589_v52 = vpop.eup %2588 }
 0x51d   :  { %v449_v54 = vpop.permute.xlu1 %448  ;;  %v319_v55 = vmul.f32 %v2589_v52, %v2581_v23  ;;  %v671_v23 = vld [vmem:[%s3134_s1 + $0x10] sm:$0xff] }
 0x51e   :  { %2322 = vmatmul.mubr.msk.f32.vlgmr.msra.gmra.mrb[0].mxu0 %vm275_vm3, %v317_v50  ;;  %2456 = vmatprep.subr.bf16.mxu0 %v2455_v51  ;;  %v2461_v31 = vpack.c.bf16 %v673_v24, %v671_v23 }
 0x51f   :  { %2324 = vmatprep.mubr.msk.f32.mxu0 %vm275_vm3, %v318_v53  ;;  %2458 = vmatpush3.bf16.msra.mxu0 %v2455_v51 }
 0x520   :  { %2331 = vmatprep.subr.msk.mxu0 %vm53_vm1, %v449_v54 }
 0x522   :  { %2325 = vmatmul.mubr.msk.f32.gmra.mrb[2].mxu0 %vm275_vm3, %v319_v55  ;;  %v2159_v55 = vld [vmem:[%s3135_s2 + $0x48] ss:$0 sm:$0xff]  ;;  %vm2126_vm3 = vcmask 211968  }
 0x523   :  { %2332 = vmatpush3.msk.msra.mxu0 %vm53_vm1, %v449_v54 }
 0x5f1   :  { %v2323_v56 = vpop.f32.mrb[0].mxu0 }
 0x5f2   :  { %v410_v57 = vpop.f32.mrb[1].mxu0 }
 0x5f3   :  { %2333 = vmatprep.mubr.msk.f32.mxu0 %vm16_vm0, %v410_v57  ;;  %v2161_v57 = vld [vmem:[%s3135_s2 + $0x49] ss:$0 sm:$0xff] }
 0x5f4   :  { %2334 = vmatmul.mubr.msk.f32.vlgmr.msra.gmra.mrb[4].mxu0 %vm16_vm0, %v2323_v56 }
 0x5f5   :  { %v2326_v58 = vpop.f32.mrb[2].mxu0 }
 0x5f6   :  { %v420_v59 = vpop.f32.mrb[3].mxu0 }
 0x5f7   :  { %2336 = vmatprep.mubr.msk.f32.mxu0 %vm16_vm0, %v420_v59  ;;  %v2836_v59 = vld [vmem:[%s3135_s2 + $0x18] sm:$0xff] }
 0x5f8   :  { %2337 = vmatmul.mubr.msk.f32.gmra.mrb[6].mxu0 %vm16_vm0, %v2326_v58  ;;  %v2831_v58 = vld [vmem:[%s3135_s2 + $0x10] sm:$0xff] }
 0x5f9   :  { %759 = vmatprep.mubr.f32.mxu0 %v2631_v34 }
 0x6c7   :  { %v2335_v60 = vpop.f32.mrb[4].mxu0 }
 0x6c8   :  { %v532_v61 = vpop.f32.mrb[5].mxu0  ;;  %v580_v3 = vadd.f32 %v2335_v60, %v2690_v27 }
 0x6c9   :  { %v579_v2 = vadd.f32 %v532_v61, %v2686_v25 }
 0x6ca   :  { %v586_v5 = vsel %vm16_vm0, %v580_v3, 0.0 }
 0x6cb   :  { %v2338_v62 = vpop.f32.mrb[6].mxu0  ;;  %v583_v4 = vsel %vm16_vm0, %v579_v2, 0.0 }
 0x6cc   :  { %569 = vrot.lane.b32.xlu1 %v2338_v62, %s2627_s22  ;;  %v542_v63 = vpop.f32.mrb[7].mxu0 }
 0x6cd   :  { %567 = vrot.lane.b32.xlu0 %v542_v63, %s2627_s22 }
 0x6ec   :  { %584 = vadd.xlane.f32.xlu0 %v583_v4  ;;  %v2850_v4 = vld [vmem:[%s3135_s2 + $0x28] sm:$0xff] }
 0x6f0   :  { %587 = vadd.xlane.f32.xlu1 %v586_v5 }
 0x73e   :  { %v570_v6 = vpop.permute.xlu1 %569 }
 0x73f   :  { %v568_v7 = vpop.permute.xlu0 %567  ;;  %v582_v9 = vadd.f32 %v570_v6, %v2690_v27  ;;  %v672_v27 = vld [vmem:[%s3134_s1 + $0x18] sm:$0xff] }
 0x740   :  { %v581_v8 = vadd.f32 %v568_v7, %v2686_v25  ;;  %v2459_v22 = vpack.c.bf16 %v674_v21, %v672_v27 }
 0x741   :  { %v592_v11 = vsel %vm16_vm0, %v582_v9, 0.0 }
 0x742   :  { %v589_v10 = vsel %vm16_vm0, %v581_v8, 0.0  ;;  %2460 = vmatprep.subr.bf16.mxu0 %v2459_v22 }
 0x743   :  { %590 = vadd.xlane.f32.xlu0 %v589_v10  ;;  %2462 = vmatpush1.bf16.msra.mxu0 %v2461_v31  ;;  %v2885_v31 = vld [vmem:[%s3135_s2 + $0x40] sm:$0xff] }
 0x744   :  { %2163 = vmatprep.subr.msk.mxu0 %vm53_vm1, %v676_v32  ;;  %v2169_v32 = vld [vmem:[%s3135_s2 + $0x4a] ss:$0 sm:$0xff] }
 0x747   :  { %593 = vadd.xlane.f32.xlu0 %v592_v11  ;;  %2164 = vmatpush1.msk.msra.mxu0 %vm53_vm1, %v675_v33 }
 0x748   :  { %2464 = vmatprep.subr.bf16.mxu0 %v2463_v47 }
 0x779   :  { %v585_v12 = vpop.xlane.xlu0 %584 }
 0x77a   :  { %v595_v13 = vmul.f32 0.05, %v585_v12 }
 0x77c   :  { %v599_v14 = vsub.f32 %v579_v2, %v595_v13  ;;  %v2467_v2 = vpack.c.bf16 %v2836_v59, %v2831_v58 }
 0x77d   :  { %v588_v15 = vpop.xlane.xlu1 %587 }
 0x77e   :  { %v596_v16 = vmul.f32 0.05, %v588_v15  ;;  %v603_v17 = vmul.f32 %v599_v14, %v599_v14  ;;  %v2160_v15 = vld [vmem:[%s3135_s2 + $0x50] ss:$0 sm:$0xff] }
 0x780   :  { %v600_v18 = vsub.f32 %v580_v3, %v596_v16  ;;  %v607_v19 = vsel %vm16_vm0, %v603_v17, 0.0  ;;  %v2845_v3 = vld [vmem:[%s3135_s2 + $0x20] sm:$0xff]  ;;  %v2162_v17 = vld [vmem:[%s3135_s2 + $0x51] ss:$0 sm:$0xff] }
 0x781   :  { %608 = vadd.xlane.f32.xlu0 %v607_v19  ;;  %v2471_v7 = vpack.c.bf16 %v2850_v4, %v2845_v3  ;;  %v2871_v19 = vld [vmem:[%s3135_s2 + $0x30] sm:$0xff] }
 0x782   :  { %v604_v20 = vmul.f32 %v600_v18, %v600_v18 }
 0x784   :  { %v610_v25 = vsel %vm16_vm0, %v604_v20, 0.0  ;;  %v2876_v20 = vld [vmem:[%s3135_s2 + $0x38] sm:$0xff] }
 0x785   :  { %611 = vadd.xlane.f32.xlu1 %v610_v25  ;;  %v2475_v27 = vpack.c.bf16 %v2876_v20, %v2871_v19 }
 0x7d0   :  { %v591_v35 = vpop.xlane.xlu0 %590 }
 0x7d1   :  { %v597_v36 = vmul.f32 0.05, %v591_v35 }
 0x7d3   :  { %v601_v37 = vsub.f32 %v581_v8, %v597_v36 }
 0x7d4   :  { %v594_v38 = vpop.xlane.xlu0 %593 }
 0x7d5   :  { %v598_v39 = vmul.f32 0.05, %v594_v38  ;;  %v605_v40 = vmul.f32 %v601_v37, %v601_v37 }
 0x7d7   :  { %v602_v41 = vsub.f32 %v582_v9, %v598_v39  ;;  %v613_v42 = vsel %vm16_vm0, %v605_v40, 0.0 }
 0x7d8   :  { %614 = vadd.xlane.f32.xlu0 %v613_v42  ;;  %v2170_v42 = vld [vmem:[%s3135_s2 + $0x52] ss:$0 sm:$0xff] }
 0x7d9   :  { %v606_v43 = vmul.f32 %v602_v41, %v602_v41 }
 0x7db   :  { %v616_v44 = vsel %vm16_vm0, %v606_v43, 0.0 }
 0x7dc   :  { %617 = vadd.xlane.f32.xlu1 %v616_v44 }
 0x80e   :  { %v609_v48 = vpop.xlane.xlu0 %608 }
 0x80f   :  { %v619_v49 = vmul.f32 0.05, %v609_v48 }
 0x811   :  { %v623_v50 = vadd.f32 1e-05, %v619_v49 }
 0x812   :  { %v612_v51 = vpop.xlane.xlu1 %611 }
 0x813   :  { %2590 = vrsqrt.f32 %v623_v50  ;;  %v620_v52 = vmul.f32 0.05, %v612_v51 }
 0x815   :  { %v624_v53 = vadd.f32 1e-05, %v620_v52 }
 0x817   :  { %2592 = vrsqrt.f32 %v624_v53 }
 0x81d   :  { %v2591_v54 = vpop.eup %2590 }
 0x81e   :  { %v631_v56 = vmul.f32 %v2591_v54, %v599_v14 }
 0x820   :  { %v649_v60 = vmul.f32 %v2159_v55, %v631_v56 }
 0x821   :  { %v2593_v61 = vpop.eup %2592 }
 0x822   :  { %v2838_v62 = vadd.f32 %v2161_v57, %v649_v60  ;;  %v632_v63 = vmul.f32 %v2593_v61, %v600_v18 }
 0x824   :  { %2165 = vmatmul.mubr.msk.f32.vlgmr.msra.gmra.mrb[8].mxu0 %vm16_vm0, %v2838_v62  ;;  %v650_v5 = vmul.f32 %v2159_v55, %v632_v63 }
 0x825   :  { %765 = vmatprep.mubr.f32.mxu0 %v2631_v34  ;;  %2466 = vmatpush3.bf16.msra.mxu0 %v2463_v47 }
 0x826   :  { %v2855_v6 = vadd.f32 %v2161_v57, %v650_v5  ;;  %2468 = vmatprep.subr.bf16.mxu0 %v2467_v2  ;;  %v2176_v57 = vld [vmem:[%s3135_s2 + $0x53] ss:$0 sm:$0xff] }
 0x828   :  { %2166 = vmatmul.mubr.msk.f32.gmra.mrb[10].mxu0 %vm16_vm0, %v2855_v6 }
 0x829   :  { %771 = vmatprep.mubr.f32.mxu0 %v2631_v34  ;;  %2470 = vmatpush3.bf16.msra.mxu0 %v2467_v2 }
 0x82a   :  { %2472 = vmatprep.subr.bf16.mxu0 %v2471_v7 }
 0x82d   :  { %2474 = vmatpush3.bf16.msra.mxu0 %v2471_v7 }
 0x82e   :  { %2476 = vmatprep.subr.bf16.mxu0 %v2475_v27 }
 0x831   :  { %2478 = vmatpush3.bf16.msra.mxu0 %v2475_v27  ;;  %v1067_v27 = vld [vmem:[%s3135_s2 + $0x61] sm:$0x1] }
 0x832   :  { %2355 = vmatprep.subr.mxu0 %v2885_v31  ;;  %2507 = vpush %v1067_v27 }
 0x835   :  { %2356 = vmatpush3.msra.mxu0 %v2885_v31 }
 0x836   :  { %2377 = vmatprep.subr.mxu0 %v2631_v34 }
 0x863   :  { %s2508_s13 = spop %2507 }
 0x865   :  { %v615_v8 = vpop.xlane.xlu0 %614 }
 0x866   :  { %v621_v9 = vmul.f32 0.05, %v615_v8 }
 0x868   :  { %v625_v10 = vadd.f32 1e-05, %v621_v9 }
 0x869   :  { %v618_v11 = vpop.xlane.xlu1 %617 }
 0x86a   :  { %2594 = vrsqrt.f32 %v625_v10  ;;  %v622_v12 = vmul.f32 0.05, %v618_v11 }
 0x86c   :  { %v626_v13 = vadd.f32 1e-05, %v622_v12 }
 0x86e   :  { %2596 = vrsqrt.f32 %v626_v13 }
 0x874   :  { %v2595_v14 = vpop.eup %2594 }
 0x875   :  { %v633_v16 = vmul.f32 %v2595_v14, %v601_v37 }
 0x877   :  { %v651_v18 = vmul.f32 %v2160_v15, %v633_v16 }
 0x878   :  { %v2597_v25 = vpop.eup %2596 }
 0x879   :  { %v669_v21 = vadd.f32 %v2162_v17, %v651_v18  ;;  %v634_v22 = vmul.f32 %v2597_v25, %v602_v41 }
 0x87b   :  { %2167 = vmatmul.mubr.msk.f32.gmra.mrb[12].mxu0 %vm16_vm0, %v669_v21  ;;  %v652_v23 = vmul.f32 %v2160_v15, %v634_v22 }
 0x87c   :  { %777 = vmatprep.mubr.f32.mxu0 %v2631_v34 }
 0x87d   :  { %v670_v24 = vadd.f32 %v2162_v17, %v652_v23 }
 0x87f   :  { %2168 = vmatmul.mubr.msk.f32.gmra.mrb[14].mxu0 %vm16_vm0, %v670_v24 }
 0x8f7   :  { %v761_v33 = vpop.f32.mrb[8].mxu0 }
 0x8f8   :  { %v802_v35 = vadd.f32 %v2169_v32, %v761_v33  ;;  %v763_v36 = vpop.f32.mrb[9].mxu0 }
 0x8f9   :  { %v2178_v36 = vld [vmem:[%s3135_s2 + $0x54] ss:$0 sm:$0xff] }
 0x8fa   :  { %v806_v37 = vmax.f32 %v802_v35, 0.0 }
 0x8fb   :  { %v767_v38 = vpop.f32.mrb[10].mxu0 }
 0x8fc   :  { %v803_v39 = vadd.f32 %v2169_v32, %v767_v38  ;;  %v769_v40 = vpop.f32.mrb[11].mxu0  ;;  %2357 = vmatprep.mubr.msk.f32.mxu0 %vm819_vm4, %v806_v37 }
 0x8fe   :  { %v807_v41 = vmax.f32 %v803_v39, 0.0  ;;  %v2180_v39 = vld [vmem:[%s3135_s2 + $0x55] ss:$0 sm:$0xff] }
 0x900   :  { %2358 = vmatmul.mubr.msk.f32.vlgmr.msra.gmra.mrb[16].mxu0 %vm819_vm4, %v807_v41 }
 0x94e   :  { %v773_v43 = vpop.f32.mrb[12].mxu0 }
 0x94f   :  { %v775_v44 = vpop.f32.mrb[13].mxu0 }
 0x950   :  { %v804_v47 = vadd.f32 %v2170_v42, %v775_v44 }
 0x952   :  { %v808_v48 = vmax.f32 %v804_v47, 0.0  ;;  %v779_v49 = vpop.f32.mrb[14].mxu0 }
 0x953   :  { %v781_v50 = vpop.f32.mrb[15].mxu0 }
 0x954   :  { %v805_v51 = vadd.f32 %v2170_v42, %v781_v50  ;;  %2360 = vmatprep.mubr.msk.f32.mxu0 %vm819_vm4, %v808_v48  ;;  %v2181_v42 = vld [vmem:[%s3135_s2 + $0x60] ss:$0 sm:$0xff] }
 0x956   :  { %v809_v52 = vmax.f32 %v805_v51, 0.0 }
 0x958   :  { %2361 = vmatmul.mubr.msk.f32.gmra.mrb[18].mxu0 %vm819_vm4, %v809_v52  ;;  %v1092_v52 = vlaneseq }
 0x959   :  { %2379 = vmatprep.mubr.msk.f32.mxu0 %vm2632_vm9, %v2631_v34 }
 0x9d3   :  { %v2901_v53 = vpop.f32.mrb[16].mxu0 }
 0x9d4   :  { %v2903_v54 = vpop.f32.mrb[17].mxu0 }
 0xa2b   :  { %v2362_v55 = vpop.f32.mrb[18].mxu0 }
 0xa2c   :  { %927 = vrot.lane.b32.xlu1 %v2362_v55, %s2627_s22  ;;  %v908_v56 = vpop.f32.mrb[19].mxu0  ;;  %v2928_v55 = vand.u32 127, %v1092_v52 }
 0xa2d   :  { %925 = vrot.lane.b32.xlu0 %v908_v56, %s2627_s22  ;;  %v2930_v56 = vshrl.u32 %v1092_v52, 7 }
 0xa2e   :  { %vm1094_vm8 = vcmp.lt.s32.totalorder %v2928_v55, 4 }
 0xa9e   :  { %v928_v60 = vpop.permute.xlu1 %927 }
 0xa9f   :  { %v954_v61 = vadd.f32 %v2176_v57, %v928_v60  ;;  %v926_v63 = vpop.permute.xlu0 %925  ;;  %v2111_v60 = vadd.s32 4294967242, %v2928_v55 }
 0xaa0   :  { %v953_v2 = vadd.f32 %v2176_v57, %v926_v63  ;;  %v2100_v57 = vadd.s32 4294967250, %v2928_v55 }
 0xaa1   :  { %v958_v5 = vadd.f32 %v954_v61, %v670_v24  ;;  %v1082_v61 = vstv %s2508_s13 }
 0xaa2   :  { %v957_v7 = vadd.f32 %v953_v2, %v669_v21  ;;  %v2103_v63 = vsub.s32 %v2100_v57, %v2930_v56 }
 0xaa3   :  { %v968_v8 = vsel %vm16_vm0, %v958_v5, 0.0 }
 0xaa4   :  { %969 = vadd.xlane.f32.xlu0 %v968_v8  ;;  %v965_v9 = vsel %vm16_vm0, %v957_v7, 0.0 }
 0xaa5   :  { %966 = vadd.xlane.f32.xlu1 %v965_v9 }
 0xb31   :  { %v970_v10 = vpop.xlane.xlu0 %969 }
 0xb32   :  { %v974_v11 = vmul.f32 0.05, %v970_v10  ;;  %v967_v12 = vpop.xlane.xlu1 %966 }
 0xb33   :  { %v973_v13 = vmul.f32 0.05, %v967_v12 }
 0xb34   :  { %v978_v14 = vsub.f32 %v958_v5, %v974_v11  ;;  %v2114_v5 = vsub.s32 %v2111_v60, %v2930_v56 }
 0xb35   :  { %v977_v15 = vsub.f32 %v957_v7, %v973_v13 }
 0xb36   :  { %v982_v16 = vmul.f32 %v978_v14, %v978_v14 }
 0xb37   :  { %v981_v17 = vmul.f32 %v977_v15, %v977_v15 }
 0xb38   :  { %v992_v18 = vsel %vm16_vm0, %v982_v16, 0.0 }
 0xb39   :  { %993 = vadd.xlane.f32.xlu1 %v992_v18  ;;  %v989_v25 = vsel %vm16_vm0, %v981_v17, 0.0 }
 0xb3a   :  { %990 = vadd.xlane.f32.xlu0 %v989_v25 }
 0xbc6   :  { %v994_v21 = vpop.xlane.xlu1 %993 }
 0xbc7   :  { %v998_v22 = vmul.f32 0.05, %v994_v21  ;;  %v991_v23 = vpop.xlane.xlu0 %990 }
 0xbc8   :  { %v997_v24 = vmul.f32 0.05, %v991_v23 }
 0xbc9   :  { %v1002_v32 = vadd.f32 1e-05, %v998_v22 }
 0xbca   :  { %v1001_v33 = vadd.f32 1e-05, %v997_v24 }
 0xbcb   :  { %2598 = vrsqrt.f32 %v1002_v32 }
 0xbcc   :  { %2600 = vrsqrt.f32 %v1001_v33 }
 0xbd5   :  { %v2599_v35 = vpop.eup %2598 }
 0xbd6   :  { %v2601_v37 = vpop.eup %2600  ;;  %v1010_v38 = vmul.f32 %v2599_v35, %v978_v14 }
 0xbd7   :  { %v1009_v40 = vmul.f32 %v2601_v37, %v977_v15 }
 0xbd8   :  { %v1028_v41 = vmul.f32 %v2178_v36, %v1010_v38 }
 0xbd9   :  { %v1027_v43 = vmul.f32 %v2178_v36, %v1009_v40 }
 0xbda   :  { %v1046_v44 = vadd.f32 %v2180_v39, %v1028_v41 }
 0xbdb   :  { %v1045_v47 = vadd.f32 %v2180_v39, %v1027_v43 }
 0xbdc   :  { %v1073_v48 = vmul.f32 %v2181_v42, %v1046_v44 }
 0xbdd   :  { %v1072_v49 = vmul.f32 %v2181_v42, %v1045_v47 }
 0xbde   :  { %v1077_v50 = vsel %vm16_vm0, %v1073_v48, 0.0 }
 0xbdf   :  { %1078 = vadd.xlane.f32.xlu1 %v1077_v50  ;;  %v1074_v51 = vsel %vm16_vm0, %v1072_v49, 0.0 }
 0xbe0   :  { %1075 = vadd.xlane.f32.xlu0 %v1074_v51 }
 0xc6c   :  { %v1079_v2 = vpop.xlane.xlu1 %1078 }
 0xc6d   :  { %v1085_v7 = vadd.f32 %v1082_v61, %v1079_v2  ;;  %v1076_v8 = vpop.xlane.xlu0 %1075 }
 0xc6e   :  { %v1084_v9 = vadd.f32 %v1082_v61, %v1076_v8 }
 0xc6f   :  { %vm1087_vm5 = vcmp.gt.f32.partialorder %v1085_v7, 0.0  ;;  %v2108_v10 = vrot.slane %v1085_v7, %v2103_v63 }
 0xc70   :  { %v2937_v11 = vsel %vm1087_vm5, 1.0, %v2631_v34  ;;  %vm1086_vm6 = vcmp.gt.f32.partialorder %v1084_v9, 0.0  ;;  %v2104_v12 = vrot.slane %v1084_v9, %v2103_v63  ;;  %vm2130_vm5 = vcmask 441344  }
 0xc71   :  { %v2119_v13 = vrot.slane %v2937_v11, %v2114_v5  ;;  %v2941_v14 = vsel %vm1086_vm6, 1.0, %v2631_v34  ;;  %v1098_v15 = vsub.f32 1.0, %v2937_v11  ;;  %v1096_v22 = vmul.f32 %v2937_v11, %v2665_v1 }
 0xc72   :  { %v2115_v16 = vrot.slane %v2941_v14, %v2114_v5  ;;  %v1097_v17 = vsub.f32 1.0, %v2941_v14  ;;  %v2947_v25 = vsel %vm1388_vm7, %v2108_v10, %v2104_v12  ;;  %v1095_v24 = vmul.f32 %v2941_v14, %v2660_v0 }
 0xc73   :  { %v1100_v18 = vmul.f32 %v1098_v15, %v2665_v1  ;;  %v1382_v10 = vsub.s32 %v2928_v55, %v2930_v56  ;;  %vm2132_vm6 = vcmask 506880  }
 0xc74   :  { %v1099_v27 = vmul.f32 %v1097_v17, %v2660_v0  ;;  %v2950_v21 = vsel %vm1388_vm7, %v2119_v13, %v2115_v16 }
 0xc75   :  { %1105 = vrot.lane.b32.xlu1 %v1100_v18, %s2627_s22  ;;  %v1387_v12 = vrot.slane %v2937_v11, %v1382_v10  ;;  %v1383_v13 = vrot.slane %v2941_v14, %v1382_v10 }
 0xc76   :  { %1103 = vrot.lane.b32.xlu0 %v1099_v27, %s2627_s22 }
 0xc77   :  { %v1410_v15 = vmul.f32 %v2937_v11, %v1387_v12  ;;  %v1409_v16 = vmul.f32 %v2941_v14, %v1383_v13 }
 0xc79   :  { %vm1412_vm11 = vcmp.gt.f32.partialorder %v1410_v15, 0.5  ;;  %vm1411_vm12 = vcmp.gt.f32.partialorder %v1409_v16, 0.5 }
 0xce7   :  { %v1106_v23 = vpop.permute.xlu1 %1105 }
 0xce8   :  { %v1110_v32 = vadd.f32 %v1106_v23, %v1096_v22  ;;  %v1104_v33 = vpop.permute.xlu0 %1103 }
 0xce9   :  { %v1109_v35 = vadd.f32 %v1104_v33, %v1095_v24 }
 0xcea   :  { %v1112_v36 = vsel %vm1094_vm8, %v1110_v32, %v2665_v1 }
 0xceb   :  { %v1116_v37 = vsel %vm16_vm0, %v1112_v36, 0.0  ;;  %v1111_v38 = vsel %vm1094_vm8, %v1109_v35, %v2660_v0  ;;  %v2479_v0 = vpack.c.bf16 %v2752_v28, %v2747_v26 }
 0xcec   :  { %1117 = vadd.xlane.f32.xlu0 %v1116_v37  ;;  %v1113_v39 = vsel %vm16_vm0, %v1111_v38, 0.0 }
 0xced   :  { %1114 = vadd.xlane.f32.xlu1 %v1113_v39  ;;  %2480 = vmatprep.subr.bf16.mxu1 %v2479_v0 }
 0xcee   :  { %2482 = vmatpush3.bf16.msra.mxu1 %v2479_v0 }
 0xcef   :  { %2367 = vmatprep.subr.msk.mxu1 %vm53_vm1, %v2762_v30 }
 0xcf2   :  { %2368 = vmatpush3.msk.msra.mxu1 %vm53_vm1, %v2762_v30 }
 0xcf3   :  { %2372 = vmatprep.subr.mxu1 %v2631_v34 }
 0xd79   :  { %v1118_v40 = vpop.xlane.xlu0 %1117 }
 0xd7a   :  { %v1120_v41 = vmul.f32 0.05, %v1118_v40  ;;  %v1115_v42 = vpop.xlane.xlu1 %1114 }
 0xd7b   :  { %v1119_v43 = vmul.f32 0.05, %v1115_v42  ;;  %v1592_v42 = vld [vmem:[%s3134_s1 + $0x58] sm:$0xf] }
 0xd7c   :  { %v1122_v44 = vsub.f32 %v1112_v36, %v1120_v41 }
 0xd7d   :  { %v1121_v47 = vsub.f32 %v1111_v38, %v1119_v43 }
 0xd7e   :  { %v1124_v48 = vmul.f32 %v1122_v44, %v1122_v44 }
 0xd7f   :  { %v1123_v49 = vmul.f32 %v1121_v47, %v1121_v47 }
 0xd80   :  { %v1128_v50 = vsel %vm16_vm0, %v1124_v48, 0.0 }
 0xd81   :  { %1129 = vadd.xlane.f32.xlu1 %v1128_v50  ;;  %v1125_v1 = vsel %vm16_vm0, %v1123_v49, 0.0 }
 0xd82   :  { %1126 = vadd.xlane.f32.xlu0 %v1125_v1 }
 0xe0e   :  { %v1130_v51 = vpop.xlane.xlu1 %1129 }
 0xe0f   :  { %v1132_v52 = vmul.f32 0.05, %v1130_v51  ;;  %v1127_v57 = vpop.xlane.xlu0 %1126 }
 0xe10   :  { %v1131_v60 = vmul.f32 0.05, %v1127_v57 }
 0xe11   :  { %v1134_v61 = vadd.f32 1e-05, %v1132_v52 }
 0xe12   :  { %v1133_v63 = vadd.f32 1e-05, %v1131_v60 }
 0xe13   :  { %2602 = vrsqrt.f32 %v1134_v61 }
 0xe14   :  { %2604 = vrsqrt.f32 %v1133_v63 }
 0xe1d   :  { %v2603_v2 = vpop.eup %2602 }
 0xe1e   :  { %v2605_v26 = vpop.eup %2604  ;;  %v2974_v5 = vmul.f32 %v2603_v2, %v1122_v44 }
 0xe1f   :  { %v2972_v28 = vmul.f32 %v2605_v26, %v1121_v47 }
 0xe21   :  { %2369 = vmatprep.mubr.msk.f32.mxu1 %vm16_vm0, %v2972_v28 }
 0xe22   :  { %2370 = vmatmul.mubr.msk.f32.vlgmr.msra.gmra.mrb[6].mxu1 %vm16_vm0, %v2974_v5 }
 0xe23   :  { %2374 = vmatprep.mubr.msk.f32.mxu1 %vm2632_vm9, %v2631_v34 }
 0xef5   :  { %v2371_v30 = vpop.f32.mrb[6].mxu1 }
 0xef6   :  { %1300 = vrot.lane.b32.xlu1 %v2371_v30, %s2627_s22  ;;  %v1213_v7 = vpop.f32.mrb[7].mxu1 }
 0xef7   :  { %1223 = vrot.lane.b32.xlu0 %v1213_v7, %s2627_s22  ;;  %s2633_s22 = smov 24  }
 0xf68   :  { %v1301_v8 = vpop.permute.xlu1 %1300 }
 0xf69   :  { %2378 = vmatpush3.xpose.msk.msra.mxu0 %vm16_vm0, %v1301_v8  ;;  %v1224_v9 = vpop.permute.xlu0 %1223 }
 0xf6a   :  { %2373 = vmatpush3.xpose.msk.msra.mxu1 %vm16_vm0, %v1224_v9  ;;  %2387 = vmatprep.subr.mxu0 %v2631_v34 }
 0xf6b   :  { %2382 = vmatprep.subr.mxu1 %v2631_v34 }
 0xf6c   :  { %2380 = vmatmul.mubr.msk.f32.vlgmr.msra.gmra.mrb[20].mxu0 %vm16_vm0, %v2371_v30 }
 0xf6d   :  { %2375 = vmatmul.mubr.msk.f32.vlgmr.msra.gmra.mrb[8].mxu1 %vm16_vm0, %v1213_v7  ;;  %2389 = vmatprep.mubr.msk.f32.mxu0 %vm2632_vm9, %v2631_v34 }
 0xf6e   :  { %2384 = vmatprep.mubr.msk.f32.mxu1 %vm2632_vm9, %v2631_v34 }
0x103f   :  { %v1372_v17 = vpop.f32.mrb[20].mxu0 }
0x1040   :  { %v1377_v18 = vmul.f32 0.2236068, %v1372_v17  ;;  %v1295_v27 = vpop.f32.mrb[8].mxu1  ;;  %v2381_v22 = vpop.f32.mrb[21].mxu0 }
0x1041   :  { %v1376_v23 = vmul.f32 0.2236068, %v1295_v27  ;;  %v2376_v24 = vpop.f32.mrb[9].mxu1 }
0x1042   :  { %v1414_v34 = vsel %vm1412_vm11, %v1377_v18, -1e+09 }
0x1043   :  { %v1419_v55 = vsel %vm1415_vm10, %v1414_v34, -inf  ;;  %v1413_v56 = vsel %vm1411_vm12, %v1376_v23, -1e+09 }
0x1044   :  { %1420 = vmax.xlane.f32.xlu0 %v1419_v55  ;;  %v1416_v32 = vsel %vm1415_vm10, %v1413_v56, -inf }
0x1045   :  { %1417 = vmax.xlane.f32.xlu1 %v1416_v32  ;;  %v2550_v32 = vpack.i.bf16 %v2818_v46, %v2813_v45 }
0x10d1   :  { %v1421_v11 = vpop.xlane.xlu0 %1420 }
0x10d2   :  { %v1423_v33 = vsub.f32 %v1414_v34, %v1421_v11  ;;  %v1418_v14 = vpop.xlane.xlu1 %1417  ;;  %v1730_v34 = vld [vmem:[%s3134_s1 + $0x48] sm:$0xff]  ;;  %v2555_v11 = vpack.i.bf16 %v2836_v59, %v2831_v58 }
0x10d3   :  { %v1422_v35 = vsub.f32 %v1413_v56, %v1418_v14  ;;  %v1731_v56 = vld [vmem:[%s3134_s1 + $0x70] sm:$0xf]  ;;  %v2565_v14 = vpack.i.bf16 %v2876_v20, %v2871_v19  ;;  %v2196_v19 = vld [vmem:[%s3135_s2 + $0x58] ss:$0 sm:$0xff] }
0x10d4   :  { %v1426_v36 = vmul.f32 1.442695, %v1423_v33  ;;  %v2560_v33 = vpack.i.bf16 %v2850_v4, %v2845_v3 }
0x10d5   :  { %v1424_v37 = vmul.f32 1.442695, %v1422_v35 }
0x10d6   :  { %2606 = vpow2.f32 %v1426_v36 }
0x10d7   :  { %2608 = vpow2.f32 %v1424_v37 }
0x10e0   :  { %v2607_v38 = vpop.eup %2606 }
0x10e1   :  { %v2609_v39 = vpop.eup %2608  ;;  %v1431_v40 = vsel %vm1415_vm10, %v2607_v38, 0.0 }
0x10e2   :  { %1432 = vadd.xlane.f32.xlu1 %v1431_v40  ;;  %v1428_v41 = vsel %vm1415_vm10, %v2609_v39, 0.0 }
0x10e3   :  { %1429 = vadd.xlane.f32.xlu0 %v1428_v41  ;;  %v2197_v41 = vld [vmem:[%s3135_s2 + $0x59] ss:$0 sm:$0xff] }
0x10f3   :  { %1514 = vrot.lane.b32.xlu1 %v2371_v30, %s2629_s5 }
0x10f7   :  { %2546 = vrot.lane.b32.xlu1 %v2756_v29, %s2633_s22 }
0x10f9   :  { %1438 = vrot.lane.b32.xlu0 %v1213_v7, %s2629_s5 }
0x10fb   :  { %1600 = vrot.lane.b32.xlu1 %v1592_v42, %s2633_s22 }
0x116f   :  { %v1433_v43 = vpop.xlane.xlu1 %1432 }
0x1170   :  { %2610 = vrcp.f32 %v1433_v43  ;;  %v1430_v44 = vpop.xlane.xlu0 %1429 }
0x1171   :  { %2612 = vrcp.f32 %v1430_v44 }
0x1173   :  { %v1515_v47 = vpop.permute.xlu1 %1514 }
0x1174   :  { %2388 = vmatpush3.msra.mxu0 %v1515_v47  ;;  %v1439_v48 = vpop.permute.xlu0 %1438 }
0x1175   :  { %2383 = vmatpush3.msra.mxu1 %v1439_v48 }
0x1177   :  { %v2547_v49 = vpop.permute.xlu1 %2546 }
0x1178   :  { %v2549_v50 = vunpack.i.h.bf16 %v2547_v49  ;;  %v2548_v1 = vunpack.i.l.bf16 %v2547_v49 }
0x117a   :  { %v2611_v0 = vpop.eup %2610  ;;  %v2483_v51 = vpack.c.bf16 %v2549_v50, %v2548_v1 }
0x117b   :  { %v2613_v52 = vpop.eup %2612  ;;  %v1437_v29 = vmul.f32 %v2611_v0, %v2607_v38  ;;  %v1601_v60 = vpop.permute.xlu1 %1600 }
0x117c   :  { %v1436_v57 = vmul.f32 %v2613_v52, %v2609_v39  ;;  %2484 = vmatprep.subr.bf16.mxu1 %v2483_v51 }
0x117d   :  { %2390 = vmatmul.mubr.msk.f32.vlgmr.msra.gmra.mrb[22].mxu0 %vm1415_vm10, %v1437_v29 }
0x117e   :  { %2385 = vmatmul.mubr.msk.f32.vlgmr.msra.gmra.mrb[10].mxu1 %vm1415_vm10, %v1436_v57 }
0x117f   :  { %2486 = vmatpush3.bf16.msra.mxu1 %v2483_v51 }
0x1180   :  { %2396 = vmatprep.subr.msk.mxu1 %vm53_vm1, %v1601_v60 }
0x1183   :  { %2397 = vmatpush3.msk.msra.mxu1 %vm53_vm1, %v1601_v60 }
0x1250   :  { %v1586_v61 = vpop.f32.mrb[22].mxu0 }
0x1251   :  { %v1510_v63 = vpop.f32.mrb[10].mxu1  ;;  %v2391_v2 = vpop.f32.mrb[23].mxu0 }
0x1252   :  { %v2386_v26 = vpop.f32.mrb[11].mxu1  ;;  %2398 = vmatprep.mubr.msk.f32.mxu1 %vm16_vm0, %v1510_v63 }
0x1253   :  { %2399 = vmatmul.mubr.msk.f32.vlgmr.msra.gmra.mrb[12].mxu1 %vm16_vm0, %v1586_v61  ;;  %v2198_v26 = vld [vmem:[%s3135_s2 + $0x5a] ss:$0 sm:$0xff] }
0x1326   :  { %v2400_v30 = vpop.f32.mrb[12].mxu1 }
0x1327   :  { %v1688_v7 = vadd.f32 %v2400_v30, %v2974_v5  ;;  %v1678_v8 = vpop.f32.mrb[13].mxu1 }
0x1328   :  { %v1687_v9 = vadd.f32 %v1678_v8, %v2972_v28  ;;  %v1729_v28 = vld [vmem:[%s3134_s1 + $0x20] sm:$0xff] }
0x1329   :  { %v1692_v10 = vsel %vm16_vm0, %v1688_v7, 0.0  ;;  %v2487_v55 = vpack.c.bf16 %v1730_v34, %v1729_v28 }
0x132a   :  { %1693 = vadd.xlane.f32.xlu1 %v1692_v10  ;;  %v1689_v12 = vsel %vm16_vm0, %v1687_v9, 0.0 }
0x132b   :  { %1690 = vadd.xlane.f32.xlu0 %v1689_v12  ;;  %2488 = vmatprep.subr.bf16.mxu0 %v2487_v55 }
0x132c   :  { %2490 = vmatpush3.bf16.msra.mxu0 %v2487_v55 }
0x132d   :  { %2405 = vmatprep.subr.msk.mxu0 %vm53_vm1, %v1731_v56 }
0x1330   :  { %2406 = vmatpush3.msk.msra.mxu0 %vm53_vm1, %v1731_v56  ;;  %vm2122_vm1 = vcmask 23552  }
0x133b   :  { %2556 = vrot.lane.b32.xlu1 %v2555_v11, %s2629_s5 }
0x133f   :  { %2561 = vrot.lane.b32.xlu1 %v2560_v33, %s2629_s5 }
0x1343   :  { %2566 = vrot.lane.b32.xlu1 %v2565_v14, %s2629_s5 }
0x13b7   :  { %v1694_v13 = vpop.xlane.xlu1 %1693 }
0x13b8   :  { %v1696_v15 = vmul.f32 0.05, %v1694_v13  ;;  %v1691_v16 = vpop.xlane.xlu0 %1690  ;;  %v2175_v13 = vld [vmem:[%s3135_s2 + $0x4b] ss:$0 sm:$0xff] }
0x13b9   :  { %v1695_v17 = vmul.f32 0.05, %v1691_v16 }
0x13ba   :  { %v1698_v18 = vsub.f32 %v1688_v7, %v1696_v15  ;;  %v2202_v15 = vld [vmem:[%s3135_s2 + $0x5b] ss:$0 sm:$0xff] }
0x13bb   :  { %v1697_v27 = vsub.f32 %v1687_v9, %v1695_v17  ;;  %v2557_v3 = vpop.permute.xlu1 %2556  ;;  %v951_v17 = vadd.f32 %v2175_v13, %v2903_v54 }
0x13bc   :  { %v1700_v24 = vmul.f32 %v1698_v18, %v1698_v18  ;;  %v2558_v39 = vunpack.i.l.bf16 %v2557_v3 }
0x13bd   :  { %v1699_v22 = vmul.f32 %v1697_v27, %v1697_v27  ;;  %v955_v34 = vadd.f32 %v951_v17, %v2838_v62 }
0x13be   :  { %v1704_v5 = vsel %vm16_vm0, %v1700_v24, 0.0 }
0x13bf   :  { %v1701_v23 = vsel %vm16_vm0, %v1699_v22, 0.0  ;;  %v2562_v47 = vpop.permute.xlu1 %2561  ;;  %v959_v56 = vsel %vm16_vm0, %v955_v34, 0.0 }
0x13c0   :  { %1702 = vadd.xlane.f32.xlu0 %v1701_v23  ;;  %v2564_v49 = vunpack.i.h.bf16 %v2562_v47  ;;  %v2563_v50 = vunpack.i.l.bf16 %v2562_v47 }
0x13c2   :  { %v2499_v51 = vpack.c.bf16 %v2564_v49, %v2563_v50 }
0x13c3   :  { %v2567_v29 = vpop.permute.xlu1 %2566 }
0x13c4   :  { %1705 = vadd.xlane.f32.xlu0 %v1704_v5  ;;  %v2569_v57 = vunpack.i.h.bf16 %v2567_v29  ;;  %v2568_v60 = vunpack.i.l.bf16 %v2567_v29  ;;  %v952_v5 = vadd.f32 %v2901_v53, %v2175_v13  ;;  %v2205_v29 = vld [vmem:[%s3135_s2 + $0x5c] ss:$0 sm:$0xff] }
0x13c6   :  { %v2503_v63 = vpack.c.bf16 %v2569_v57, %v2568_v60 }
0x13da   :  { %2551 = vrot.lane.b32.xlu0 %v2550_v32, %s2629_s5  ;;  %v956_v32 = vadd.f32 %v952_v5, %v2855_v6 }
0x13dc   :  { %v962_v54 = vsel %vm16_vm0, %v956_v32, 0.0 }
0x13de   :  { %1862 = vrot.lane.b32.xlu0 %v2885_v31, %s2629_s5  ;;  %v2559_v31 = vunpack.i.h.bf16 %v2557_v3 }
0x13e0   :  { %v2495_v43 = vpack.c.bf16 %v2559_v31, %v2558_v39 }
0x144d   :  { %v1703_v45 = vpop.xlane.xlu0 %1702 }
0x144e   :  { %v1707_v46 = vmul.f32 0.05, %v1703_v45 }
0x1450   :  { %v1709_v58 = vadd.f32 1e-05, %v1707_v46 }
0x1451   :  { %v1706_v59 = vpop.xlane.xlu0 %1705 }
0x1452   :  { %2614 = vrsqrt.f32 %v1709_v58  ;;  %v1708_v35 = vmul.f32 0.05, %v1706_v59 }
0x1454   :  { %v1710_v36 = vadd.f32 1e-05, %v1708_v35 }
0x1455   :  { %v2552_v37 = vpop.permute.xlu0 %2551 }
0x1456   :  { %2616 = vrsqrt.f32 %v1710_v36  ;;  %v2554_v20 = vunpack.i.h.bf16 %v2552_v37  ;;  %v2553_v38 = vunpack.i.l.bf16 %v2552_v37 }
0x1458   :  { %v2491_v42 = vpack.c.bf16 %v2554_v20, %v2553_v38 }
0x1459   :  { %v1863_v2 = vpop.permute.xlu0 %1862 }
0x145a   :  { %2492 = vmatprep.subr.bf16.mxu1 %v2491_v42 }
0x145b   :  { %2494 = vmatpush3.bf16.msra.mxu1 %v2491_v42 }
0x145c   :  { %v2615_v4 = vpop.eup %2614  ;;  %2496 = vmatprep.subr.bf16.mxu1 %v2495_v43 }
0x145d   :  { %v1713_v40 = vmul.f32 %v2615_v4, %v1697_v27 }
0x145f   :  { %v1720_v44 = vmul.f32 %v2196_v19, %v1713_v40  ;;  %2498 = vmatpush3.bf16.msra.mxu1 %v2495_v43 }
0x1460   :  { %v2617_v48 = vpop.eup %2616  ;;  %2500 = vmatprep.subr.bf16.mxu1 %v2499_v51 }
0x1461   :  { %v1714_v1 = vmul.f32 %v2617_v48, %v1698_v18  ;;  %v1727_v0 = vadd.f32 %v2197_v41, %v1720_v44 }
0x1463   :  { %v1721_v52 = vmul.f32 %v2196_v19, %v1714_v1  ;;  %2407 = vmatprep.mubr.msk.f32.mxu0 %vm16_vm0, %v1727_v0  ;;  %2502 = vmatpush3.bf16.msra.mxu1 %v2499_v51 }
0x1464   :  { %2504 = vmatprep.subr.bf16.mxu1 %v2503_v63 }
0x1465   :  { %v1728_v61 = vadd.f32 %v2197_v41, %v1721_v52 }
0x1467   :  { %2408 = vmatmul.mubr.msk.f32.vlgmr.msra.gmra.mrb[24].mxu0 %vm16_vm0, %v1728_v61  ;;  %2506 = vmatpush3.bf16.msra.mxu1 %v2503_v63 }
0x1468   :  { %2426 = vmatprep.subr.mxu1 %v1863_v2 }
0x146b   :  { %2427 = vmatpush3.msra.mxu1 %v1863_v2 }
0x153a   :  { %v2409_v30 = vpop.f32.mrb[24].mxu0 }
0x153b   :  { %v1818_v7 = vadd.f32 %v2409_v30, %v2198_v26  ;;  %v1812_v8 = vpop.f32.mrb[25].mxu0 }
0x153c   :  { %v1813_v9 = vadd.f32 %v2198_v26, %v1812_v8  ;;  %v2177_v8 = vld [vmem:[%s3135_s2 + $0x4c] ss:$0 sm:$0xff] }
0x153d   :  { %v1822_v12 = vmax.f32 %v1818_v7, 0.0 }
0x153e   :  { %v1821_v10 = vmax.f32 %v1813_v9, 0.0 }
0x1540   :  { %2428 = vmatprep.mubr.msk.f32.mxu1 %vm819_vm4, %v1821_v10 }
0x1541   :  { %2429 = vmatmul.mubr.msk.f32.vlgmr.msra.gmra.mrb[14].mxu1 %vm819_vm4, %v1822_v12  ;;  %v2179_v12 = vld [vmem:[%s3135_s2 + $0x4d] ss:$0 sm:$0xff]  ;;  %vm2128_vm4 = vcmask 375808  }
0x1614   :  { %v2430_v16 = vpop.f32.mrb[14].mxu1 }
0x1615   :  { %v1951_v18 = vadd.f32 %v2430_v16, %v2202_v15  ;;  %v1945_v27 = vpop.f32.mrb[15].mxu1 }
0x1616   :  { %v1946_v22 = vadd.f32 %v2202_v15, %v1945_v27 }
0x1617   :  { %v1955_v23 = vadd.f32 %v1951_v18, %v1728_v61  ;;  %v2206_v61 = vld [vmem:[%s3135_s2 + $0x5d] ss:$0 sm:$0xff] }
0x1618   :  { %v1954_v24 = vadd.f32 %v1946_v22, %v1727_v0 }
0x1619   :  { %v1959_v28 = vsel %vm16_vm0, %v1955_v23, 0.0 }
0x161a   :  { %1960 = vadd.xlane.f32.xlu0 %v1959_v28  ;;  %v1956_v55 = vsel %vm16_vm0, %v1954_v24, 0.0 }
0x161b   :  { %1957 = vadd.xlane.f32.xlu1 %v1956_v55 }
0x161e   :  { %960 = vadd.xlane.f32.xlu0 %v959_v56 }
0x1622   :  { %963 = vadd.xlane.f32.xlu0 %v962_v54 }
0x16a7   :  { %v1961_v11 = vpop.xlane.xlu0 %1960 }
0x16a8   :  { %v1963_v33 = vmul.f32 0.05, %v1961_v11  ;;  %v1958_v14 = vpop.xlane.xlu1 %1957 }
0x16a9   :  { %v1962_v53 = vmul.f32 0.05, %v1958_v14 }
0x16aa   :  { %v1965_v45 = vsub.f32 %v1955_v23, %v1963_v33 }
0x16ab   :  { %v1964_v46 = vsub.f32 %v1954_v24, %v1962_v53  ;;  %v961_v58 = vpop.xlane.xlu0 %960 }
0x16ac   :  { %v971_v62 = vmul.f32 0.05, %v961_v58  ;;  %v1967_v59 = vmul.f32 %v1965_v45, %v1965_v45 }
0x16ad   :  { %v1966_v35 = vmul.f32 %v1964_v46, %v1964_v46 }
0x16ae   :  { %v975_v36 = vsub.f32 %v955_v34, %v971_v62  ;;  %v1971_v37 = vsel %vm16_vm0, %v1967_v59, 0.0 }
0x16af   :  { %1972 = vadd.xlane.f32.xlu0 %v1971_v37  ;;  %v964_v3 = vpop.xlane.xlu0 %963  ;;  %v1968_v6 = vsel %vm16_vm0, %v1966_v35, 0.0 }
0x16b0   :  { %v972_v4 = vmul.f32 0.05, %v964_v3  ;;  %1969 = vadd.xlane.f32.xlu1 %v1968_v6  ;;  %v979_v19 = vmul.f32 %v975_v36, %v975_v36 }
0x16b2   :  { %v976_v20 = vsub.f32 %v956_v32, %v972_v4  ;;  %v983_v38 = vsel %vm16_vm0, %v979_v19, 0.0  ;;  %v2212_v19 = vld [vmem:[%s3135_s2 + $0x66] ss:$0 sm:$0xff] }
0x16b4   :  { %984 = vadd.xlane.f32.xlu1 %v983_v38  ;;  %v980_v31 = vmul.f32 %v976_v20, %v976_v20 }
0x16b6   :  { %v986_v39 = vsel %vm16_vm0, %v980_v31, 0.0 }
0x16b7   :  { %987 = vadd.xlane.f32.xlu0 %v986_v39 }
0x173c   :  { %v1973_v40 = vpop.xlane.xlu0 %1972 }
0x173d   :  { %v1975_v41 = vmul.f32 0.05, %v1973_v40  ;;  %v1970_v42 = vpop.xlane.xlu1 %1969  ;;  %v2213_v40 = vld [vmem:[%s3135_s2 + $0x67] ss:$0 sm:$0xff] }
0x173e   :  { %v1974_v43 = vmul.f32 0.05, %v1970_v42 }
0x173f   :  { %v1977_v44 = vadd.f32 1e-05, %v1975_v41 }
0x1740   :  { %v1976_v47 = vadd.f32 1e-05, %v1974_v43 }
0x1741   :  { %2618 = vrsqrt.f32 %v1977_v44  ;;  %v985_v48 = vpop.xlane.xlu1 %984 }
0x1742   :  { %2620 = vrsqrt.f32 %v1976_v47  ;;  %v995_v49 = vmul.f32 0.05, %v985_v48 }
0x1744   :  { %v999_v50 = vadd.f32 1e-05, %v995_v49  ;;  %v988_v1 = vpop.xlane.xlu0 %987 }
0x1745   :  { %v996_v0 = vmul.f32 0.05, %v988_v1 }
0x1746   :  { %2622 = vrsqrt.f32 %v999_v50 }
0x1747   :  { %v1000_v51 = vadd.f32 1e-05, %v996_v0 }
0x1749   :  { %2624 = vrsqrt.f32 %v1000_v51  ;;  %v2207_v51 = vld [vmem:[%s3135_s2 + $0x62] ss:$0 sm:$0xff] }
0x174b   :  { %v2619_v52 = vpop.eup %2618 }
0x174c   :  { %v2621_v57 = vpop.eup %2620  ;;  %v1981_v60 = vmul.f32 %v2619_v52, %v1965_v45  ;;  %v2208_v52 = vld [vmem:[%s3135_s2 + $0x63] ss:$0 sm:$0xff] }
0x174d   :  { %v1980_v63 = vmul.f32 %v2621_v57, %v1964_v46 }
0x174e   :  { %v1988_v2 = vmul.f32 %v2205_v29, %v1981_v60  ;;  %v2209_v60 = vld [vmem:[%s3135_s2 + $0x64] ss:$0 sm:$0xff] }
0x174f   :  { %v1987_v26 = vmul.f32 %v2205_v29, %v1980_v63 }
0x1750   :  { %v2623_v30 = vpop.eup %2622  ;;  %v1995_v7 = vadd.f32 %v2206_v61, %v1988_v2 }
0x1751   :  { %v1994_v9 = vadd.f32 %v2206_v61, %v1987_v26  ;;  %v1007_v10 = vmul.f32 %v2623_v30, %v975_v36 }
0x1752   :  { %v2004_v13 = vsel %vm16_vm0, %v1995_v7, 0.0 }
0x1753   :  { %v2625_v15 = vpop.eup %2624  ;;  %v1025_v16 = vmul.f32 %v2177_v8, %v1007_v10  ;;  %v1996_v17 = vsel %vm16_vm0, %v1994_v9, 0.0  ;;  %v2005_v18 = vrot.slane %v2004_v13, 4  ;;  %v2214_v10 = vld [vmem:[%s3135_s2 + $0x5e] ss:$0 sm:$0xff] }
0x1754   :  { %v1008_v27 = vmul.f32 %v2625_v15, %v976_v20  ;;  %v1997_v22 = vrot.slane %v1996_v17, 4  ;;  %v2211_v20 = vld [vmem:[%s3135_s2 + $0x65] ss:$0 sm:$0xff] }
0x1755   :  { %v1043_v23 = vadd.f32 %v2179_v12, %v1025_v16  ;;  %v2006_v24 = vadd.f32 %v2005_v18, %v2004_v13 }
0x1756   :  { %v1026_v5 = vmul.f32 %v2177_v8, %v1008_v27  ;;  %v1998_v28 = vadd.f32 %v1997_v22, %v1996_v17 }
0x1757   :  { %v2007_v34 = vrot.slane %v2006_v24, 2  ;;  %v1047_v55 = vsel %vm16_vm0, %v1043_v23, 0.0 }
0x1758   :  { %v1044_v56 = vadd.f32 %v2179_v12, %v1026_v5  ;;  %v1999_v32 = vrot.slane %v1998_v28, 2  ;;  %v1048_v54 = vrot.slane %v1047_v55, 4 }
0x1759   :  { %v2008_v11 = vadd.f32 %v2007_v34, %v2006_v24  ;;  %v2210_v24 = vld [vmem:[%s3135_s2 + $0x4e] ss:$0 sm:$0xff] }
0x175a   :  { %v2000_v33 = vadd.f32 %v1999_v32, %v1998_v28  ;;  %v1049_v14 = vadd.f32 %v1048_v54, %v1047_v55  ;;  %v1056_v53 = vsel %vm16_vm0, %v1044_v56, 0.0  ;;  %vm2044_vm0 = vcmask 15360  }
0x175b   :  { %v2009_v45 = vrot.slane %v2008_v11, 1  ;;  %v1057_v46 = vrot.slane %v1056_v53, 4 }
0x175c   :  { %v2001_v58 = vrot.slane %v2000_v33, 1  ;;  %v1050_v62 = vrot.slane %v1049_v14, 2 }
0x175d   :  { %v2010_v59 = vadd.f32 %v2009_v45, %v2008_v11  ;;  %v1058_v35 = vadd.f32 %v1057_v46, %v1056_v53 }
0x175e   :  { %v2002_v36 = vadd.f32 %v2001_v58, %v2000_v33  ;;  %v1051_v37 = vadd.f32 %v1050_v62, %v1049_v14 }
0x175f   :  { %v2011_v3 = vmul.f32 0.125, %v2010_v59  ;;  %v1059_v6 = vrot.slane %v1058_v35, 2 }
0x1760   :  { %v2003_v4 = vmul.f32 0.125, %v2002_v36  ;;  %v1052_v38 = vrot.slane %v1051_v37, 1 }
0x1761   :  { %v1060_v31 = vadd.f32 %v1059_v6, %v1058_v35 }
0x1762   :  { %v2012_v39 = vsel %vm1064_vm13, %v2003_v4, %v2011_v3  ;;  %v1053_v43 = vadd.f32 %v1052_v38, %v1051_v37 }
0x1763   :  { %v2066_v41 = vmul.f32 %v2212_v19, %v2012_v39  ;;  %v2057_v42 = vmul.f32 %v2211_v20, %v2012_v39  ;;  %v1061_v44 = vrot.slane %v1060_v31, 1  ;;  %v2075_v49 = vmul.f32 %v2213_v40, %v2012_v39 }
0x1764   :  { %v1055_v1 = vmul.f32 0.125, %v1053_v43 }
0x1765   :  { %v2067_v47 = vsel %vm2020_vm14, %v2066_v41, 0.0  ;;  %v2058_v48 = vsel %vm2020_vm14, %v2057_v42, 0.0  ;;  %v1062_v50 = vadd.f32 %v1061_v44, %v1060_v31  ;;  %v2076_v29 = vsel %vm2020_vm14, %v2075_v49, 0.0 }
0x1766   :  { %2068 = vadd.xlane.f32.xlu0 %v2067_v47  ;;  %2059 = vadd.xlane.f32.xlu1 %v2058_v48 }
0x1767   :  { %v1063_v0 = vmul.f32 0.125, %v1062_v50 }
0x1769   :  { %v1065_v57 = vsel %vm1064_vm13, %v1055_v1, %v1063_v0 }
0x176a   :  { %2077 = vadd.xlane.f32.xlu1 %v2076_v29  ;;  %v2019_v61 = vmul.f32 %v2207_v51, %v1065_v57  ;;  %v2029_v63 = vmul.f32 %v2208_v52, %v1065_v57  ;;  %v2038_v30 = vmul.f32 %v2209_v60, %v1065_v57 }
0x176c   :  { %v2021_v2 = vsel %vm2020_vm14, %v2019_v61, 0.0  ;;  %v2030_v26 = vsel %vm2020_vm14, %v2029_v63, 0.0  ;;  %v2039_v7 = vsel %vm2020_vm14, %v2038_v30, 0.0 }
0x176d   :  { %2022 = vadd.xlane.f32.xlu0 %v2021_v2 }
0x176e   :  { %2031 = vadd.xlane.f32.xlu1 %v2030_v26 }
0x1771   :  { %2040 = vadd.xlane.f32.xlu0 %v2039_v7 }
0x1787   :  { %2091 = vrot.lane.b32.xlu0 %v1065_v57, %s2634_s21 }
0x17f3   :  { %v2060_v8 = vpop.xlane.xlu1 %2059  ;;  %v2069_v9 = vpop.xlane.xlu0 %2068 }
0x17f4   :  { %v2079_v12 = vsel %vm2042_vm15, %v2060_v8, %v2069_v9 }
0x17f7   :  { %v2078_v13 = vpop.xlane.xlu1 %2077 }
0x17f8   :  { %v2080_v15 = vsel %vm2044_vm0, %v2079_v12, %v2078_v13 }
0x17f9   :  { %v2085_v16 = vadd.f32 %v2214_v10, %v2080_v15 }
0x17fa   :  { %v2023_v17 = vpop.xlane.xlu0 %2022 }
0x17fb   :  { %2087 = vrot.lane.b32.xlu1 %v2085_v16, %s2635_s24  ;;  %v2032_v18 = vpop.xlane.xlu1 %2031 }
0x17fc   :  { %v2043_v27 = vsel %vm2042_vm15, %v2023_v17, %v2032_v18 }
0x17fe   :  { %v2041_v22 = vpop.xlane.xlu0 %2040 }
0x17ff   :  { %v2045_v23 = vsel %vm2044_vm0, %v2043_v27, %v2041_v22  ;;  %2095 = vrot.lane.b32.xlu1 %v2012_v39, %s2636_s25 }
0x1800   :  { %v2050_v5 = vadd.f32 %v2210_v24, %v2045_v23 }
0x1802   :  { %v2092_v55 = vpop.permute.xlu0 %2091 }
0x186d   :  { %v2088_v28 = vpop.permute.xlu1 %2087 }
0x186e   :  { %v2123_v34 = vsel %vm2122_vm1, %v2050_v5, %v2088_v28 }
0x186f   :  { %v2125_v56 = vsel %vm2124_vm2, %v2123_v34, %v2092_v55 }
0x1871   :  { %v2096_v32 = vpop.permute.xlu1 %2095 }
0x1872   :  { %v2127_v54 = vsel %vm2126_vm3, %v2125_v56, %v2096_v32 }
0x1873   :  { %v2129_v11 = vsel %vm2128_vm4, %v2127_v54, %v2947_v25 }
0x1874   :  { %v2131_v33 = vsel %vm2130_vm5, %v2129_v11, %v2950_v21 }
0x1875   :  { %v2133_v14 = vsel %vm2132_vm6, %v2131_v33, 0.0 }
0x1876   :  { %2134 = vst [vmem:[%s3136_s3] sm:$0x3] %v2133_v14 }

</bundles_post_ra>
